<compile_context>
chip_gen: v6e
topology: v6e:2x2x1
jax: 0.10.0
libtpu: 0.0.40
codegen_flags: <defaults>
</compile_context>

<pallas_src>
import functools

import jax
import jax.numpy as jnp
from jax.experimental import pallas as pl
from jax.experimental.pallas import tpu as pltpu


# ------------------------------- helpers ----------------------------------- #

def _round_up(n, m):
    return ((n + m - 1) // m) * m


def _pad2(a, rows, cols):
    r, c = a.shape
    return jnp.pad(a, ((0, rows - r), (0, cols - c)))


# ----------------------------- Pallas kernels ------------------------------- #

def _make_sage_layer_kernel(*, project_first, fp, hp, epilogue, out_valid_cols,
                            training):
    """One fused SAGEConv layer over a (target-row-tile, source-K-tile) grid.

    epilogue: "relu_dropout" (layer 1) or "log_softmax" (layer 2).
    project_first selects the static matmul order.
    """
    use_dropout = training and epilogue == "relu_dropout"

    def _epilogue(h, seed_ref, o_ref):
        if epilogue == "relu_dropout":
            h = jnp.maximum(h, 0.0)
            if use_dropout:
                # dropout(p=0.5); reseed per row tile -> independent masks per tile.
                # TODO(synk): torch's dropout RNG stream cannot be reproduced bit-for-bit.
                pltpu.prng_seed(seed_ref[0] + pl.program_id(0))
                bits = pltpu.prng_random_bits(h.shape)
                keep = (bits & 1) == 1
                h = jnp.where(keep, h * 2.0, 0.0)
            o_ref[...] = h.astype(o_ref.dtype)
        else:
            # masked log_softmax over the real (unpadded) output channels, in f32
            col = jax.lax.broadcasted_iota(jnp.int32, h.shape, 1)
            valid = col < out_valid_cols
            logits = jnp.where(valid, h, -1e30)
            m = jnp.max(logits, axis=-1, keepdims=True)
            s = logits - m
            e = jnp.where(valid, jnp.exp(s), 0.0)
            lse = jnp.log(jnp.sum(e, axis=-1, keepdims=True))
            o_ref[...] = jnp.where(valid, s - lse, 0.0).astype(o_ref.dtype)

    if project_first:
        # h[i] = inv_deg[i] * sum_k adj[i,k] @ (x[k] @ Wl^T) + x[i] @ Wr^T + b
        # A single 2*hp-wide projection of each source tile feeds BOTH lin_l & lin_r.
        def kernel(adj_ref, x_ref, invd_ref, w_ref, b_ref, *rest):
            if use_dropout:
                seed_ref, o_ref, acc_ref, root_ref = rest
            else:
                seed_ref = None
                o_ref, acc_ref, root_ref = rest
            i = pl.program_id(0)
            k = pl.program_id(1)

            @pl.when(k == 0)
            def _():
                acc_ref[...] = jnp.zeros_like(acc_ref)
                root_ref[...] = jnp.zeros_like(root_ref)

            z = jnp.dot(x_ref[...], w_ref[...],
                        preferred_element_type=jnp.float32)            # [tk, 2*hp]
            acc_ref[...] += jnp.dot(adj_ref[...], z[:, :hp].astype(jnp.bfloat16),
                                    preferred_element_type=jnp.float32)

            # NeighborSampler puts targets first and tm == tk, so K-tile i holds
            # exactly the root rows of output row-tile i.
            @pl.when(k == i)
            def _():
                root_ref[...] = z[:, hp:]

            @pl.when(k == pl.num_programs(1) - 1)
            def _():
                h = acc_ref[...] * invd_ref[...] + root_ref[...] + b_ref[...]
                _epilogue(h, seed_ref, o_ref)

        return kernel

    # aggregate-first:
    # h[i] = [inv_deg[i] * sum_k adj[i,k] @ x[k]  |  x_root[i]] @ [[Wl^T],[Wr^T]] + b
    def kernel(adj_ref, x_ref, xroot_ref, invd_ref, w_ref, b_ref, *rest):
        if use_dropout:
            seed_ref, o_ref, acc_ref, lhs_ref = rest
        else:
            seed_ref = None
            o_ref, acc_ref, lhs_ref = rest
        k = pl.program_id(1)

        @pl.when(k == 0)
        def _():
            acc_ref[...] = jnp.zeros_like(acc_ref)

        acc_ref[...] += jnp.dot(adj_ref[...], x_ref[...],
                                preferred_element_type=jnp.float32)     # [tm, fp]

        @pl.when(k == pl.num_programs(1) - 1)
        def _():
            # pack [mean-agg | root] lane-wise -> one 2*fp-deep matmul for lin_l+lin_r
            lhs_ref[:, 0:fp] = (acc_ref[...] * invd_ref[...]).astype(jnp.bfloat16)
            lhs_ref[:, fp:2 * fp] = xroot_ref[...]
            h = jnp.dot(lhs_ref[...], w_ref[...],
                        preferred_element_type=jnp.float32) + b_ref[...]
            _epilogue(h, seed_ref, o_ref)

    return kernel


def _sage_layer(adj, inv_deg, x, w_cat, w_stack, b, *, n_tgt_p, n_src_p, fp, hp,
                epilogue, out_dtype, out_valid_cols=0, training=False, seed=0,
                tm=128, tk=128):
    """One SAGEConv layer (+ fused epilogue) as a tiled pallas_call."""
    assert tm == tk and n_tgt_p % tm == 0 and n_src_p % tk == 0
    assert n_tgt_p <= n_src_p
    assert w_cat.shape == (fp, 2 * hp) and w_stack.shape == (2 * fp, hp)

    # static per-layer matmul-order choice (padded MAC compare)
    pf_macs = n_src_p * fp * (2 * hp) + n_tgt_p * n_src_p * hp
    af_macs = n_tgt_p * n_src_p * fp + n_tgt_p * (2 * fp) * hp
    project_first = pf_macs <= af_macs

    grid = (n_tgt_p // tm, n_src_p // tk)

    adj_spec = pl.BlockSpec((tm, tk), lambda i, k: (i, k))
    xsrc_spec = pl.BlockSpec((tk, fp), lambda i, k: (k, 0))
    xroot_spec = pl.BlockSpec((tm, fp), lambda i, k: (i, 0))
    invd_spec = pl.BlockSpec((tm, 1), lambda i, k: (i, 0))
    bias_spec = pl.BlockSpec((1, hp), lambda i, k: (0, 0))

    if project_first:
        w = w_cat
        w_spec = pl.BlockSpec((fp, 2 * hp), lambda i, k: (0, 0))
        args = [adj, x, inv_deg, w, b]
        in_specs = [adj_spec, xsrc_spec, invd_spec, w_spec, bias_spec]
        scratch = [pltpu.VMEM((tm, hp), jnp.float32),        # aggregation accumulator
                   pltpu.VMEM((tm, hp), jnp.float32)]        # root-term stash
    else:
        w = w_stack
        w_spec = pl.BlockSpec((2 * fp, hp), lambda i, k: (0, 0))
        args = [adj, x, x, inv_deg, w, b]                    # x passed twice (src + root views)
        in_specs = [adj_spec, xsrc_spec, xroot_spec, invd_spec, w_spec, bias_spec]
        scratch = [pltpu.VMEM((tm, fp), jnp.float32),            # aggregation accumulator
                   pltpu.VMEM((tm, 2 * fp), jnp.bfloat16)]       # [agg | root] matmul LHS

    use_dropout = training and epilogue == "relu_dropout"
    if use_dropout:
        args.append(jnp.asarray(seed, jnp.int32).reshape(1))
        in_specs.append(pl.BlockSpec(memory_space=pltpu.MemorySpace.SMEM))

    flops = 2 * (pf_macs if project_first else af_macs)
    transcendentals = n_tgt_p * (hp + 1) if epilogue == "log_softmax" else 0
    bytes_accessed = (adj.size * adj.dtype.itemsize
                      + x.size * x.dtype.itemsize * (1 if project_first else 2)
                      + w.size * w.dtype.itemsize
                      + inv_deg.size * 4 + b.size * 4
                      + n_tgt_p * hp * jnp.dtype(out_dtype).itemsize)

    kernel = _make_sage_layer_kernel(
        project_first=project_first, fp=fp, hp=hp, epilogue=epilogue,
        out_valid_cols=out_valid_cols, training=training)

    return pl.pallas_call(
        kernel,
        out_shape=jax.ShapeDtypeStruct((n_tgt_p, hp), out_dtype),
        grid_spec=pltpu.PrefetchScalarGridSpec(
            num_scalar_prefetch=0,
            grid=grid,
            in_specs=in_specs,
            out_specs=pl.BlockSpec((tm, hp), lambda i, k: (i, 0)),
            scratch_shapes=scratch),
        compiler_params=pltpu.CompilerParams(
            dimension_semantics=("parallel", "arbitrary"),
            vmem_limit_bytes=32 * 1024 * 1024),
        cost_estimate=pl.CostEstimate(
            flops=flops, transcendentals=transcendentals,
            bytes_accessed=bytes_accessed),
    )(*args)


# ------------------------------- JAX glue ----------------------------------- #

def _build_adj_invdeg(edge_index, n_src_pad, n_dst_pad):
    """Dense edge-count adjacency (exact small ints, bf16) + f32 inverse degree.

    TODO(synk): replace with a scalar-prefetch CSR row-gather aggregation at real
                NeighborSampler scale (dense adjacency is >99% zeros there).
    """
    src, dst = edge_index[0], edge_index[1]
    counts = jnp.zeros((n_dst_pad, n_src_pad), jnp.float32).at[dst, src].add(1.0)
    deg = jnp.sum(counts, axis=1, keepdims=True)
    inv_deg = 1.0 / jnp.maximum(deg, 1.0)          # mean applied in f32 epilogue
    return counts.astype(jnp.bfloat16), inv_deg


def init_sage_conv_params(key, in_channels, out_channels):
    """SAGEConv parameters (lin_l: Linear(in,out,bias=True); lin_r: no bias)."""
    k1, k2 = jax.random.split(key)
    limit = (6.0 / (in_channels + out_channels)) ** 0.5
    w_l = jax.random.uniform(k1, (out_channels, in_channels), jnp.float32, -limit, limit)
    w_r = jax.random.uniform(k2, (out_channels, in_channels), jnp.float32, -limit, limit)
    b = jnp.zeros((out_channels,), jnp.float32)
    return {"w_l": w_l, "w_r": w_r, "b": b}


def prepare_sage_params(p):
    """Pre-transpose / pad / concatenate weights once, in both fused layouts:
         w_cat   = [Wl^T | Wr^T]   -> [Fp, 2*Hp]  (project-first, 256-wide MXU N)
         w_stack = [[Wl^T],[Wr^T]] -> [2*Fp, Hp]  (aggregate-first, 256-deep MXU K)
    """
    out_c, in_c = p["w_l"].shape
    fp, hp = _round_up(in_c, 128), _round_up(out_c, 128)
    wlT = _pad2(jnp.transpose(p["w_l"]), fp, hp)
    wrT = _pad2(jnp.transpose(p["w_r"]), fp, hp)
    return {
        "w_cat": jnp.concatenate([wlT, wrT], axis=1).astype(jnp.bfloat16),
        "w_stack": jnp.concatenate([wlT, wrT], axis=0).astype(jnp.bfloat16),
        "b": jnp.pad(p["b"], (0, hp - out_c)).reshape(1, hp).astype(jnp.float32),
    }


def sage_forward(params, x, edge_index1, edge_index2, *, sizes, out_channels,
                 training=False, dropout_seed=0):
    """Mirrors SAGE.forward: conv1 -> relu -> dropout(0.5, training) -> conv2 -> log_softmax.
       `sizes` = ((n_src1, n_tgt1), (n_src2, n_tgt2)) as static Python ints with
       NeighborSampler's targets-first node ordering."""
    (n_src1, n_tgt1), (n_src2, n_tgt2) = sizes
    n_nodes = x.shape[0]
    assert n_src1 == n_nodes and n_src2 == n_tgt1
    assert n_tgt1 <= n_nodes and n_tgt2 <= n_tgt1

    fp = params[0]["w_cat"].shape[0]
    hp = params[0]["w_cat"].shape[1] // 2
    op = params[1]["w_cat"].shape[1] // 2
    assert params[1]["w_cat"].shape[0] == hp

    np_ = _round_up(n_nodes, 128)
    t1p = _round_up(n_tgt1, 128)
    t2p = _round_up(n_tgt2, 128)

    adj1, invd1 = _build_adj_invdeg(edge_index1, np_, t1p)
    adj2, invd2 = _build_adj_invdeg(edge_index2, t1p, t2p)
    xp = _pad2(x.astype(jnp.float32), np_, fp).astype(jnp.bfloat16)

    h = _sage_layer(adj1, invd1, xp,
                    params[0]["w_cat"], params[0]["w_stack"], params[0]["b"],
                    n_tgt_p=t1p, n_src_p=np_, fp=fp, hp=hp,
                    epilogue="relu_dropout", out_dtype=jnp.bfloat16,
                    training=training, seed=dropout_seed)

    out = _sage_layer(adj2, invd2, h,
                      params[1]["w_cat"], params[1]["w_stack"], params[1]["b"],
                      n_tgt_p=t2p, n_src_p=t1p, fp=hp, hp=op,
                      epilogue="log_softmax", out_dtype=jnp.float32,
                      out_valid_cols=out_channels, training=False)

    return out[:n_tgt2, :out_channels]


def ref_forward(raw_params, x, edge_index1, edge_index2, n_tgt1, n_tgt2):
    """Pure-JAX f32 reference with PyG SAGEConv(mean) semantics (eval mode)."""
    def conv(p, x_src, x_tgt, ei, n_dst):
        a = jnp.zeros((n_dst, x_src.shape[0]), jnp.float32).at[ei[1], ei[0]].add(1.0)
        deg = jnp.maximum(jnp.sum(a, axis=1, keepdims=True), 1.0)
        agg = (a @ x_src) / deg
        return agg @ p["w_l"].T + x_tgt @ p["w_r"].T + p["b"]

    h = jnp.maximum(conv(raw_params[0], x, x[:n_tgt1], edge_index1, n_tgt1), 0.0)
    out = conv(raw_params[1], h, h[:n_tgt2], edge_index2, n_tgt2)
    return jax.nn.log_softmax(out, axis=-1)


# --------------------------------- demo ------------------------------------- #

if __name__ == "__main__":
    key = jax.random.PRNGKey(0)
    k_x, k_e1s, k_e1d, k_e2s, k_e2d, k_p1, k_p2 = jax.random.split(key, 7)

    num_nodes = 200
    in_channels, hidden_channels, out_channels = 32, 32, 8
    n_tgt1, n_tgt2 = 160, 16           # sampled-subgraph target sizes per hop
    n_edges1, n_edges2 = 640, 96

    x = jax.random.normal(k_x, (num_nodes, in_channels), jnp.float32)

    # adjs[i] = (edge_index, e_id, size) as in torch_geometric NeighborSampler;
    # targets-first node ordering (target j == node j).
    edge_index1 = jnp.stack([
        jax.random.randint(k_e1s, (n_edges1,), 0, num_nodes),   # source nodes
        jax.random.randint(k_e1d, (n_edges1,), 0, n_tgt1),      # target nodes
    ])
    edge_index2 = jnp.stack([
        jax.random.randint(k_e2s, (n_edges2,), 0, n_tgt1),
        jax.random.randint(k_e2d, (n_edges2,), 0, n_tgt2),
    ])
    sizes = ((num_nodes, n_tgt1), (n_tgt1, n_tgt2))             # static Python ints

    raw_params = [
        init_sage_conv_params(k_p1, in_channels, hidden_channels),
        init_sage_conv_params(k_p2, hidden_channels, out_channels),
    ]
    params = [prepare_sage_params(p) for p in raw_params]       # fuse/pad/transpose once

    fwd = jax.jit(functools.partial(
        sage_forward, sizes=sizes, out_channels=out_channels, training=False))
    out = fwd(params, x, edge_index1, edge_index2)
    jax.block_until_ready(out)

    assert out.shape == (n_tgt2, out_channels)
    # log_softmax rows must sum (in prob space) to ~1
    assert bool(jnp.all(jnp.abs(jnp.sum(jnp.exp(out), axis=-1) - 1.0) < 1e-4))
    # parity with a pure-JAX f32 reference (bf16 MXU inputs -> loose tolerance)
    ref = ref_forward(raw_params, x, edge_index1, edge_index2, n_tgt1, n_tgt2)
    assert bool(jnp.max(jnp.abs(out - ref)) < 0.3)

    print("KERNEL_OK")
</pallas_src>

<mosaic_0001>
module attributes {stable_mosaic.version = 11 : i64} {
  func.func private @main(%arg0: i32) attributes {dimension_semantics = [#tpu.dimension_semantics<core_parallel>], iteration_bounds = array<i64: 2>, tpu.core_type = #tpu.core_type<sc_scalar_subcore>, window_params = []} {
    return
  }
}

module attributes {stable_mosaic.version = 11 : i64} {
  func.func private @main(%arg0: i32) attributes {dimension_semantics = [#tpu.dimension_semantics<core_parallel>], iteration_bounds = array<i64: 2>, tpu.core_type = #tpu.core_type<sc_scalar_subcore>, window_params = []} {
    return
  }
}

module attributes {stable_mosaic.version = 11 : i64} {
  func.func @kernel(%arg0: i32, %arg1: i32, %arg2: memref<128x128xbf16, #tpu.memory_space<vmem>>, %arg3: memref<128x128xbf16, #tpu.memory_space<vmem>>, %arg4: memref<128x1xf32, #tpu.memory_space<vmem>>, %arg5: memref<128x256xbf16, #tpu.memory_space<vmem>>, %arg6: memref<1x128xf32, #tpu.memory_space<vmem>>, %arg7: memref<128x128xbf16, #tpu.memory_space<vmem>>, %arg8: memref<128x128xf32, #tpu.memory_space<vmem>>, %arg9: memref<128x128xf32, #tpu.memory_space<vmem>>) attributes {dimension_semantics = [#tpu.dimension_semantics<parallel>, #tpu.dimension_semantics<arbitrary>], iteration_bounds = array<i64: 2, 2>, scalar_prefetch = 0 : i64, scratch_operands = 2 : i64, tpu.core_type = #tpu.core_type<tc>, window_params = [{transform_indices = @transform_0, window_bounds = array<i64: 128, 128>}, {transform_indices = @transform_1, window_bounds = array<i64: 128, 128>}, {transform_indices = @transform_2, window_bounds = array<i64: 128, 1>}, {pipeline_mode = #tpu.pipeline_mode<synchronous>, transform_indices = @transform_3, window_bounds = array<i64: 128, 256>}, {pipeline_mode = #tpu.pipeline_mode<synchronous>, transform_indices = @transform_4, window_bounds = array<i64: 1, 128>}, {transform_indices = @transform_5, window_bounds = array<i64: 128, 128>}]} {
    %c0_i32 = arith.constant 0 : i32
    %0 = arith.cmpi eq, %arg1, %c0_i32 : i32
    %1 = arith.extui %0 : i1 to i32
    %c0_i32_0 = arith.constant 0 : i32
    %2 = arith.cmpi ne, %1, %c0_i32_0 : i32
    scf.if %2 {
      %cst_13 = arith.constant 0.000000e+00 : f32
      %19 = vector.broadcast %cst_13 : f32 to vector<128x128xf32>
      %c0_14 = arith.constant 0 : index
      %c0_15 = arith.constant 0 : index
      %20 = vector.load %arg8[%c0_14, %c0_15] : memref<128x128xf32, #tpu.memory_space<vmem>>, vector<128x128xf32>
      tpu.vector_store %arg8[%c0_14, %c0_15], %19 {strides = array<i32>} : memref<128x128xf32, #tpu.memory_space<vmem>>, vector<128x128xf32>,
      %cst_16 = arith.constant 0.000000e+00 : f32
      %21 = vector.broadcast %cst_16 : f32 to vector<128x128xf32>
      %c0_17 = arith.constant 0 : index
      %c0_18 = arith.constant 0 : index
      %22 = vector.load %arg9[%c0_17, %c0_18] : memref<128x128xf32, #tpu.memory_space<vmem>>, vector<128x128xf32>
      tpu.vector_store %arg9[%c0_17, %c0_18], %21 {strides = array<i32>} : memref<128x128xf32, #tpu.memory_space<vmem>>, vector<128x128xf32>,
    } else {
    }
    %c0 = arith.constant 0 : index
    %c0_1 = arith.constant 0 : index
    %3 = vector.load %arg3[%c0, %c0_1] : memref<128x128xbf16, #tpu.memory_space<vmem>>, vector<128x128xbf16>
    %c0_2 = arith.constant 0 : index
    %c0_3 = arith.constant 0 : index
    %4 = vector.load %arg5[%c0_2, %c0_3] : memref<128x256xbf16, #tpu.memory_space<vmem>>, vector<128x256xbf16>
    %cst = arith.constant dense<0.000000e+00> : vector<128x256xf32>
    %5 = tpu.matmul %3, %4, %cst {dimension_numbers = #tpu.dot_dimension_numbers<[1], [0], [0], [1], [0, 0, 1, 1], [], []>} : vector<128x128xbf16>, vector<128x256xbf16>, vector<128x256xf32> -> vector<128x256xf32>
    %c0_4 = arith.constant 0 : index
    %c0_5 = arith.constant 0 : index
    %6 = vector.load %arg8[%c0_4, %c0_5] : memref<128x128xf32, #tpu.memory_space<vmem>>, vector<128x128xf32>
    %c0_6 = arith.constant 0 : index
    %c0_7 = arith.constant 0 : index
    %7 = vector.load %arg2[%c0_6, %c0_7] : memref<128x128xbf16, #tpu.memory_space<vmem>>, vector<128x128xbf16>
    %8 = vector.extract_strided_slice %5 {offsets = [0, 0], sizes = [128, 128], strides = [1, 1]} : vector<128x256xf32> to vector<128x128xf32>
    %9 = arith.truncf %8 : vector<128x128xf32> to vector<128x128xbf16>
    %cst_8 = arith.constant dense<0.000000e+00> : vector<128x128xf32>
    %10 = tpu.matmul %7, %9, %cst_8 {dimension_numbers = #tpu.dot_dimension_numbers<[1], [0], [0], [1], [0, 0, 1, 1], [], []>} : vector<128x128xbf16>, vector<128x128xbf16>, vector<128x128xf32> -> vector<128x128xf32>
    %11 = arith.addf %6, %10 : vector<128x128xf32>
    %c0_9 = arith.constant 0 : index
    %c0_10 = arith.constant 0 : index
    %12 = vector.load %arg8[%c0_9, %c0_10] : memref<128x128xf32, #tpu.memory_space<vmem>>, vector<128x128xf32>
    tpu.vector_store %arg8[%c0_9, %c0_10], %11 {strides = array<i32>} : memref<128x128xf32, #tpu.memory_space<vmem>>, vector<128x128xf32>,
    %13 = arith.cmpi eq, %arg1, %arg0 : i32
    %14 = arith.extui %13 : i1 to i32
    %c0_i32_11 = arith.constant 0 : i32
    %15 = arith.cmpi ne, %14, %c0_i32_11 : i32
    scf.if %15 {
      %19 = vector.extract_strided_slice %5 {offsets = [0, 128], sizes = [128, 128], strides = [1, 1]} : vector<128x256xf32> to vector<128x128xf32>
      %c0_13 = arith.constant 0 : index
      %c0_14 = arith.constant 0 : index
      %20 = vector.load %arg9[%c0_13, %c0_14] : memref<128x128xf32, #tpu.memory_space<vmem>>, vector<128x128xf32>
      tpu.vector_store %arg9[%c0_13, %c0_14], %19 {strides = array<i32>} : memref<128x128xf32, #tpu.memory_space<vmem>>, vector<128x128xf32>,
    } else {
    }
    %c1_i32 = arith.constant 1 : i32
    %16 = arith.cmpi eq, %arg1, %c1_i32 : i32
    %17 = arith.extui %16 : i1 to i32
    %c0_i32_12 = arith.constant 0 : i32
    %18 = arith.cmpi ne, %17, %c0_i32_12 : i32
    scf.if %18 {
      %c0_13 = arith.constant 0 : index
      %c0_14 = arith.constant 0 : index
      %19 = vector.load %arg8[%c0_13, %c0_14] : memref<128x128xf32, #tpu.memory_space<vmem>>, vector<128x128xf32>
      %c0_15 = arith.constant 0 : index
      %c0_16 = arith.constant 0 : index
      %20 = vector.load %arg4[%c0_15, %c0_16] : memref<128x1xf32, #tpu.memory_space<vmem>>, vector<128x1xf32>
      %21 = vector.broadcast %20 : vector<128x1xf32> to vector<128x128xf32>
      %22 = arith.mulf %19, %21 : vector<128x128xf32>
      %c0_17 = arith.constant 0 : index
      %c0_18 = arith.constant 0 : index
      %23 = vector.load %arg9[%c0_17, %c0_18] : memref<128x128xf32, #tpu.memory_space<vmem>>, vector<128x128xf32>
      %24 = arith.addf %22, %23 : vector<128x128xf32>
      %c0_19 = arith.constant 0 : index
      %c0_20 = arith.constant 0 : index
      %25 = vector.load %arg6[%c0_19, %c0_20] : memref<1x128xf32, #tpu.memory_space<vmem>>, vector<1x128xf32>
      %26 = vector.broadcast %25 : vector<1x128xf32> to vector<128x128xf32>
      %27 = arith.addf %24, %26 : vector<128x128xf32>
      %cst_21 = arith.constant 0.000000e+00 : f32
      %28 = vector.broadcast %cst_21 : f32 to vector<128x128xf32>
      %29 = arith.maximumf %27, %28 : vector<128x128xf32>
      %30 = arith.truncf %29 : vector<128x128xf32> to vector<128x128xbf16>
      %c0_22 = arith.constant 0 : index
      %c0_23 = arith.constant 0 : index
      %31 = vector.load %arg7[%c0_22, %c0_23] : memref<128x128xbf16, #tpu.memory_space<vmem>>, vector<128x128xbf16>
      tpu.vector_store %arg7[%c0_22, %c0_23], %30 {strides = array<i32>} : memref<128x128xbf16, #tpu.memory_space<vmem>>, vector<128x128xbf16>,
    } else {
    }
    return
  }
  func.func @transform_0(%arg0: i32, %arg1: i32) -> (i32, i32) {
    %c0_i32 = arith.constant 0 : i32
    return %arg0, %arg1 : i32, i32
  }
  func.func @transform_1(%arg0: i32, %arg1: i32) -> (i32, i32) {
    %c0_i32 = arith.constant 0 : i32
    %c0_i32_0 = arith.constant 0 : i32
    return %arg1, %c0_i32 : i32, i32
  }
  func.func @transform_2(%arg0: i32, %arg1: i32) -> (i32, i32) {
    %c0_i32 = arith.constant 0 : i32
    %c0_i32_0 = arith.constant 0 : i32
    return %arg0, %c0_i32 : i32, i32
  }
  func.func @transform_3(%arg0: i32, %arg1: i32) -> (i32, i32) {
    %c0_i32 = arith.constant 0 : i32
    %c0_i32_0 = arith.constant 0 : i32
    %c0_i32_1 = arith.constant 0 : i32
    return %c0_i32, %c0_i32_0 : i32, i32
  }
  func.func @transform_4(%arg0: i32, %arg1: i32) -> (i32, i32) {
    %c0_i32 = arith.constant 0 : i32
    %c0_i32_0 = arith.constant 0 : i32
    %c0_i32_1 = arith.constant 0 : i32
    return %c0_i32, %c0_i32_0 : i32, i32
  }
  func.func @transform_5(%arg0: i32, %arg1: i32) -> (i32, i32) {
    %c0_i32 = arith.constant 0 : i32
    %c0_i32_0 = arith.constant 0 : i32
    return %arg0, %c0_i32 : i32, i32
  }
}

module attributes {stable_mosaic.version = 11 : i64} {
  func.func @kernel(%arg0: i32, %arg1: i32, %arg2: memref<128x128xbf16, #tpu.memory_space<vmem>>, %arg3: memref<128x128xbf16, #tpu.memory_space<vmem>>, %arg4: memref<128x128xbf16, #tpu.memory_space<vmem>>, %arg5: memref<128x1xf32, #tpu.memory_space<vmem>>, %arg6: memref<256x128xbf16, #tpu.memory_space<vmem>>, %arg7: memref<1x128xf32, #tpu.memory_space<vmem>>, %arg8: memref<128x128xf32, #tpu.memory_space<vmem>>, %arg9: memref<128x128xf32, #tpu.memory_space<vmem>>, %arg10: memref<128x256xbf16, #tpu.memory_space<vmem>>) attributes {dimension_semantics = [#tpu.dimension_semantics<parallel>, #tpu.dimension_semantics<arbitrary>], iteration_bounds = array<i64: 1, 2>, scalar_prefetch = 0 : i64, scratch_operands = 2 : i64, tpu.core_type = #tpu.core_type<tc>, window_params = [{transform_indices = @transform_0, window_bounds = array<i64: 128, 128>}, {transform_indices = @transform_1, window_bounds = array<i64: 128, 128>}, {transform_indices = @transform_2, window_bounds = array<i64: 128, 128>}, {transform_indices = @transform_3, window_bounds = array<i64: 128, 1>}, {pipeline_mode = #tpu.pipeline_mode<synchronous>, transform_indices = @transform_4, window_bounds = array<i64: 256, 128>}, {pipeline_mode = #tpu.pipeline_mode<synchronous>, transform_indices = @transform_5, window_bounds = array<i64: 1, 128>}, {transform_indices = @transform_6, window_bounds = array<i64: 128, 128>}]} {
    %c0_i32 = arith.constant 0 : i32
    %0 = arith.cmpi eq, %arg1, %c0_i32 : i32
    %1 = arith.extui %0 : i1 to i32
    %c0_i32_0 = arith.constant 0 : i32
    %2 = arith.cmpi ne, %1, %c0_i32_0 : i32
    scf.if %2 {
      %cst_9 = arith.constant 0.000000e+00 : f32
      %12 = vector.broadcast %cst_9 : f32 to vector<128x128xf32>
      %c0_10 = arith.constant 0 : index
      %c0_11 = arith.constant 0 : index
      %13 = vector.load %arg9[%c0_10, %c0_11] : memref<128x128xf32, #tpu.memory_space<vmem>>, vector<128x128xf32>
      tpu.vector_store %arg9[%c0_10, %c0_11], %12 {strides = array<i32>} : memref<128x128xf32, #tpu.memory_space<vmem>>, vector<128x128xf32>,
    } else {
    }
    %c0 = arith.constant 0 : index
    %c0_1 = arith.constant 0 : index
    %3 = vector.load %arg9[%c0, %c0_1] : memref<128x128xf32, #tpu.memory_space<vmem>>, vector<128x128xf32>
    %c0_2 = arith.constant 0 : index
    %c0_3 = arith.constant 0 : index
    %4 = vector.load %arg2[%c0_2, %c0_3] : memref<128x128xbf16, #tpu.memory_space<vmem>>, vector<128x128xbf16>
    %c0_4 = arith.constant 0 : index
    %c0_5 = arith.constant 0 : index
    %5 = vector.load %arg3[%c0_4, %c0_5] : memref<128x128xbf16, #tpu.memory_space<vmem>>, vector<128x128xbf16>
    %cst = arith.constant dense<0.000000e+00> : vector<128x128xf32>
    %6 = tpu.matmul %4, %5, %cst {dimension_numbers = #tpu.dot_dimension_numbers<[1], [0], [0], [1], [0, 0, 1, 1], [], []>} : vector<128x128xbf16>, vector<128x128xbf16>, vector<128x128xf32> -> vector<128x128xf32>
    %7 = arith.addf %3, %6 : vector<128x128xf32>
    %c0_6 = arith.constant 0 : index
    %c0_7 = arith.constant 0 : index
    %8 = vector.load %arg9[%c0_6, %c0_7] : memref<128x128xf32, #tpu.memory_space<vmem>>, vector<128x128xf32>
    tpu.vector_store %arg9[%c0_6, %c0_7], %7 {strides = array<i32>} : memref<128x128xf32, #tpu.memory_space<vmem>>, vector<128x128xf32>,
    %c1_i32 = arith.constant 1 : i32
    %9 = arith.cmpi eq, %arg1, %c1_i32 : i32
    %10 = arith.extui %9 : i1 to i32
    %c0_i32_8 = arith.constant 0 : i32
    %11 = arith.cmpi ne, %10, %c0_i32_8 : i32
    scf.if %11 {
      %c0_9 = arith.constant 0 : index
      %c0_10 = arith.constant 0 : index
      %12 = vector.load %arg9[%c0_9, %c0_10] : memref<128x128xf32, #tpu.memory_space<vmem>>, vector<128x128xf32>
      %c0_11 = arith.constant 0 : index
      %c0_12 = arith.constant 0 : index
      %13 = vector.load %arg5[%c0_11, %c0_12] : memref<128x1xf32, #tpu.memory_space<vmem>>, vector<128x1xf32>
      %14 = vector.broadcast %13 : vector<128x1xf32> to vector<128x128xf32>
      %15 = arith.mulf %12, %14 : vector<128x128xf32>
      %16 = arith.truncf %15 : vector<128x128xf32> to vector<128x128xbf16>
      %c0_13 = arith.constant 0 : index
      %c0_14 = arith.constant 0 : index
      %17 = vector.load %arg10[%c0_13, %c0_14] : memref<128x256xbf16, #tpu.memory_space<vmem>>, vector<128x128xbf16>
      tpu.vector_store %arg10[%c0_13, %c0_14], %16 {strides = array<i32>} : memref<128x256xbf16, #tpu.memory_space<vmem>>, vector<128x128xbf16>,
      %c0_15 = arith.constant 0 : index
      %c0_16 = arith.constant 0 : index
      %18 = vector.load %arg4[%c0_15, %c0_16] : memref<128x128xbf16, #tpu.memory_space<vmem>>, vector<128x128xbf16>
      %c0_17 = arith.constant 0 : index
      %c128 = arith.constant 128 : index
      %19 = vector.load %arg10[%c0_17, %c128] : memref<128x256xbf16, #tpu.memory_space<vmem>>, vector<128x128xbf16>
      tpu.vector_store %arg10[%c0_17, %c128], %18 {strides = array<i32>} : memref<128x256xbf16, #tpu.memory_space<vmem>>, vector<128x128xbf16>,
      %c0_18 = arith.constant 0 : index
      %c0_19 = arith.constant 0 : index
      %20 = vector.load %arg10[%c0_18, %c0_19] : memref<128x256xbf16, #tpu.memory_space<vmem>>, vector<128x256xbf16>
      %c0_20 = arith.constant 0 : index
      %c0_21 = arith.constant 0 : index
      %21 = vector.load %arg6[%c0_20, %c0_21] : memref<256x128xbf16, #tpu.memory_space<vmem>>, vector<256x128xbf16>
      %cst_22 = arith.constant dense<0.000000e+00> : vector<128x128xf32>
      %22 = tpu.matmul %20, %21, %cst_22 {dimension_numbers = #tpu.dot_dimension_numbers<[1], [0], [0], [1], [0, 0, 1, 1], [], []>} : vector<128x256xbf16>, vector<256x128xbf16>, vector<128x128xf32> -> vector<128x128xf32>
      %c0_23 = arith.constant 0 : index
      %c0_24 = arith.constant 0 : index
      %23 = vector.load %arg7[%c0_23, %c0_24] : memref<1x128xf32, #tpu.memory_space<vmem>>, vector<1x128xf32>
      %24 = vector.broadcast %23 : vector<1x128xf32> to vector<128x128xf32>
      %25 = arith.addf %22, %24 : vector<128x128xf32>
      %26 = tpu.iota {dimensions = array<i32: 1>} : vector<128x128xi32>
      %c8_i32 = arith.constant 8 : i32
      %27 = vector.broadcast %c8_i32 : i32 to vector<128x128xi32>
      %28 = arith.cmpi slt, %26, %27 : vector<128x128xi32>
      %cst_25 = arith.constant -1.000000e+30 : f32
      %29 = vector.broadcast %cst_25 : f32 to vector<128x128xf32>
      %30 = arith.select %28, %25, %29 : vector<128x128xi1>, vector<128x128xf32>
      %cst_26 = arith.constant dense<0xFF800000> : vector<128xf32>
      %31 = vector.multi_reduction <maximumf>, %30, %cst_26 [1] : vector<128x128xf32> to vector<128xf32>
      %32 = vector.shape_cast %31 : vector<128xf32> to vector<128x1xf32>
      %33 = vector.broadcast %32 : vector<128x1xf32> to vector<128x128xf32>
      %34 = arith.subf %30, %33 : vector<128x128xf32>
      %35 = math.exp %34 : vector<128x128xf32>
      %cst_27 = arith.constant 0.000000e+00 : f32
      %36 = vector.broadcast %cst_27 : f32 to vector<128x128xf32>
      %37 = arith.select %28, %35, %36 : vector<128x128xi1>, vector<128x128xf32>
      %cst_28 = arith.constant dense<0.000000e+00> : vector<128xf32>
      %38 = vector.multi_reduction <add>, %37, %cst_28 [1] : vector<128x128xf32> to vector<128xf32>
      %39 = vector.shape_cast %38 : vector<128xf32> to vector<128x1xf32>
      %40 = math.log %39 : vector<128x1xf32>
      %41 = vector.broadcast %40 : vector<128x1xf32> to vector<128x128xf32>
      %42 = arith.subf %34, %41 : vector<128x128xf32>
      %cst_29 = arith.constant 0.000000e+00 : f32
      %43 = vector.broadcast %cst_29 : f32 to vector<128x128xf32>
      %44 = arith.select %28, %42, %43 : vector<128x128xi1>, vector<128x128xf32>
      %c0_30 = arith.constant 0 : index
      %c0_31 = arith.constant 0 : index
      %45 = vector.load %arg8[%c0_30, %c0_31] : memref<128x128xf32, #tpu.memory_space<vmem>>, vector<128x128xf32>
      tpu.vector_store %arg8[%c0_30, %c0_31], %44 {strides = array<i32>} : memref<128x128xf32, #tpu.memory_space<vmem>>, vector<128x128xf32>,
    } else {
    }
    return
  }
  func.func @transform_0(%arg0: i32, %arg1: i32) -> (i32, i32) {
    %c0_i32 = arith.constant 0 : i32
    return %arg0, %arg1 : i32, i32
  }
  func.func @transform_1(%arg0: i32, %arg1: i32) -> (i32, i32) {
    %c0_i32 = arith.constant 0 : i32
    %c0_i32_0 = arith.constant 0 : i32
    return %arg1, %c0_i32 : i32, i32
  }
  func.func @transform_2(%arg0: i32, %arg1: i32) -> (i32, i32) {
    %c0_i32 = arith.constant 0 : i32
    %c0_i32_0 = arith.constant 0 : i32
    return %arg0, %c0_i32 : i32, i32
  }
  func.func @transform_3(%arg0: i32, %arg1: i32) -> (i32, i32) {
    %c0_i32 = arith.constant 0 : i32
    %c0_i32_0 = arith.constant 0 : i32
    return %arg0, %c0_i32 : i32, i32
  }
  func.func @transform_4(%arg0: i32, %arg1: i32) -> (i32, i32) {
    %c0_i32 = arith.constant 0 : i32
    %c0_i32_0 = arith.constant 0 : i32
    %c0_i32_1 = arith.constant 0 : i32
    return %c0_i32, %c0_i32_0 : i32, i32
  }
  func.func @transform_5(%arg0: i32, %arg1: i32) -> (i32, i32) {
    %c0_i32 = arith.constant 0 : i32
    %c0_i32_0 = arith.constant 0 : i32
    %c0_i32_1 = arith.constant 0 : i32
    return %c0_i32, %c0_i32_0 : i32, i32
  }
  func.func @transform_6(%arg0: i32, %arg1: i32) -> (i32, i32) {
    %c0_i32 = arith.constant 0 : i32
    %c0_i32_0 = arith.constant 0 : i32
    return %arg0, %c0_i32 : i32, i32
  }
}

</mosaic_0001>

<bundles_post_ra>
// kernel: sage_forward.2
= control target key start
LH: loop header
LB: loop body
LE: loop exit
PB: predicated region body
PF: predicated region fallthrough
CT: control target
= control target key end

     0   :  { %s1693_s18 = smov 0   ;;  %s1695_s19 = smov 0   ;;  %s1975_s0 = inlined_call_operand.vmem [shape: bf16[256,256], index: 0, kind: input, shape index: {}]   ;;  %s1976_s1 = inlined_call_operand.vmem [shape: bf16[256,128], index: 1, kind: input, shape index: {}]   ;;  %s1977_s2 = inlined_call_operand.vmem [shape: f32[256,1], index: 2, kind: input, shape index: {}]   ;;  %s1978_s3 = inlined_call_operand.vmem [shape: bf16[128,256], index: 3, kind: input, shape index: {}]   ;;  %s1979_s4 = inlined_call_operand.vmem [shape: f32[1,128], index: 4, kind: input, shape index: {}]   ;;  %s1980_s5 = inlined_call_operand.vmem [shape: bf16[256,128], index: 5, kind: output, shape index: {}]  }
   0x1   :  { %s1697_s20 = smov 0   ;;  %s1699_s21 = smov 0  }
   0x2   :  { %s1701_s22 = smov 0   ;;  %s1703_s23 = smov 0  }
   0x3   :  { %s1705_s24 = smov 0  }
   0x4 LB: > { %s24_s25 = sadd.s32 1, %s1650_s22  ;;  %s27_s26 = sadd.s32 1, %s1654_s23  ;;  %s1658_s24 = sphi %s1705_s24, %s15_s24   ;;  %s1654_s23 = sphi %s1703_s23, %s1986_s23   ;;  %s1650_s22 = sphi %s1701_s22, %s1985_s22   ;;  %s1646_s21 = sphi %s1699_s21, %s1984_s21   ;;  %s1642_s20 = sphi %s1697_s20, %s1983_s20   ;;  %s1638_s19 = sphi %s1695_s19, %s1982_s19   ;;  %s1634_s18 = sphi %s1693_s18, %s1981_s18  }
   0x5   : > { %p25_p0 = scmp.ge.s32.totalorder %s24_s25, 2  ;;  %p43_p1 = scmp.ne.s32.totalorder %s1638_s19, %s1634_s18 }
   0x6   : > { %p44_p2 = scmp.eq.s32.totalorder %s1658_s24, 0  ;;  %s36_s30 = sadd.s32 1, %s1638_s19 }
   0x7   : > { %s1988_s25 = smov (%p25_p0, %s24_s25), 0  ;;  %s1990_s26 = smov (!%p25_p0, %s27_s26), %s1654_s23 }
   0x8   : > { %p45_p3 = por %p44_p2, %p43_p1  ;;  %p29_p4 = scmp.ge.s32.totalorder %s1990_s26, 2 }
   0x9   : > { %s32_s27 = ssub.s32 %s1650_s22, %s1988_s25  ;;  %p1324_p6 = scmp.ge.s32.totalorder %s1658_s24, 4 }
   0xa   : > { %s1992_s26 = smov (%p29_p4, %s1990_s26), 0 }
   0xb   : > { %s31_s28 = ssub.s32 %s1654_s23, %s1992_s26  ;;  %195 = sbr.rel (%p1324_p6) target bundleno = 32 (0x20), region = 24 }
   0xc   : > { %s33_s29 = sor.u32 %s32_s27, %s31_s28 }
   0xd   : > { %p34_p5 = scmp.eq.s32.totalorder %s33_s29, 0 }
   0xf   : > { %s1744_s6 = scalar_select %p34_p5, %s1638_s19, %s36_s30  }
  0x10   : > { %198 = sbr.rel (!%p45_p3) target bundleno = 32 (0x20), region = 28  ;;  %s200_s7 = sand.u32 (%p45_p3), 1, %s1638_s19  }
  0x11   : > { %s1391_s8 = sshll.u32 (%p45_p3), %s1654_s23, 5  ;;  %s1325_s9 = sshll.u32 (%p45_p3), %s200_s7, 6 }
  0x12   : > { %s205_s10 = sadd.s32 (%p45_p3), %s1650_s22, %s1391_s8  ;;  %s202_s15 = scalar_lea.vmem (%p45_p3), [#allocation4], %s1325_s9 }
  0x13   : > { %s1328_s11 = sshll.u32 (%p45_p3), %s205_s10, 2 }
  0x14   : > { %s1753_s14 = scalar_lea.vmem (%p45_p3), %s1975_s0, %s1328_s11 }
  0x15   : > { %v224_v0 = vld [vmem:[%s1753_s14] sm:$0xf]  ;;  %v226_v1 = vld [vmem:[%s1753_s14 + $0x8] sm:$0xf]  ;;  %v228_v2 = vld [vmem:[%s1753_s14 + $0x10] sm:$0xf] }
  0x16   : > { %225 = vst [vmem:[%s202_s15] sm:$0xf] %v224_v0  ;;  %227 = vst [vmem:[%s202_s15 + $0x4] sm:$0xf] %v226_v1  ;;  %v230_v3 = vld [vmem:[%s1753_s14 + $0x18] sm:$0xf] }
  0x17   : > { %229 = vst [vmem:[%s202_s15 + $0x8] sm:$0xf] %v228_v2  ;;  %v232_v4 = vld [vmem:[%s1753_s14 + $0x20] sm:$0xf]  ;;  %v234_v5 = vld [vmem:[%s1753_s14 + $0x28] sm:$0xf] }
  0x18   : > { %231 = vst [vmem:[%s202_s15 + $0xc] sm:$0xf] %v230_v3  ;;  %233 = vst [vmem:[%s202_s15 + $0x10] sm:$0xf] %v232_v4  ;;  %v236_v6 = vld [vmem:[%s1753_s14 + $0x30] sm:$0xf] }
  0x19   : > { %235 = vst [vmem:[%s202_s15 + $0x14] sm:$0xf] %v234_v5  ;;  %v238_v7 = vld [vmem:[%s1753_s14 + $0x38] sm:$0xf]  ;;  %v240_v8 = vld [vmem:[%s1753_s14 + $0x40] sm:$0xf] }
  0x1a   : > { %237 = vst [vmem:[%s202_s15 + $0x18] sm:$0xf] %v236_v6  ;;  %239 = vst [vmem:[%s202_s15 + $0x1c] sm:$0xf] %v238_v7  ;;  %v242_v9 = vld [vmem:[%s1753_s14 + $0x48] sm:$0xf] }
  0x1b   : > { %241 = vst [vmem:[%s202_s15 + $0x20] sm:$0xf] %v240_v8  ;;  %v244_v10 = vld [vmem:[%s1753_s14 + $0x50] sm:$0xf]  ;;  %v246_v11 = vld [vmem:[%s1753_s14 + $0x58] sm:$0xf] }
  0x1c   : > { %243 = vst [vmem:[%s202_s15 + $0x24] sm:$0xf] %v242_v9  ;;  %245 = vst [vmem:[%s202_s15 + $0x28] sm:$0xf] %v244_v10  ;;  %v248_v12 = vld [vmem:[%s1753_s14 + $0x60] sm:$0xf] }
  0x1d   : > { %247 = vst [vmem:[%s202_s15 + $0x2c] sm:$0xf] %v246_v11  ;;  %v250_v13 = vld [vmem:[%s1753_s14 + $0x68] sm:$0xf]  ;;  %v252_v14 = vld [vmem:[%s1753_s14 + $0x70] sm:$0xf] }
  0x1e   : > { %249 = vst [vmem:[%s202_s15 + $0x30] sm:$0xf] %v248_v12  ;;  %251 = vst [vmem:[%s202_s15 + $0x34] sm:$0xf] %v250_v13  ;;  %v254_v15 = vld [vmem:[%s1753_s14 + $0x78] sm:$0xf] }
  0x1f   : > { %253 = vst [vmem:[%s202_s15 + $0x38] sm:$0xf] %v252_v14  ;;  %255 = vst [vmem:[%s202_s15 + $0x3c] sm:$0xf] %v254_v15 }
  0x20 PF: > { %p1329_p7 = scmp.ge.s32.totalorder %s1658_s24, 1  ;;  %p328_p8 = scmp.lt.s32.totalorder %s1658_s24, 5 }
  0x22   : > { %p329_p9 = pnand %p1329_p7, %p328_p8 }
  0x23   : > { %s335_s16 = sand.u32 (!%p329_p9), 1, %s1634_s18   ;;  %s1331_s17 = sshll.u32 (!%p329_p9), %s1642_s20, 4 }
  0x24   : > { %332 = sbr.rel (%p329_p9) target bundleno = 793 (0x319), region = 77  ;;  %s1330_s27 = sshll.u32 (!%p329_p9), %s335_s16, 6 }
  0x25   : > { %p374_p10 = scmp.lt.s32.totalorder (!%p329_p9), %s1331_s17, 31  ;;  %s1333_s28 = sshll.u32 (!%p329_p9), %s1646_s21, 4 }
  0x26   : > { %p380_p11 = scmp.lt.s32.totalorder (!%p329_p9), %s1333_s28, 31  ;;  %s1791_s16 = scalar_lea.vmem (!%p329_p9), [#allocation4], %s1330_s27 }
  0x27   : > { %p1337_p12 = scmp.ne.s32.totalorder (!%p329_p9), %s1642_s20, 0 }
  0x29   : > { %s1994_s17 = smov (!%p374_p10, %s1331_s17), 31  ;;  %s1996_s28 = smov (!%p380_p11, %s1333_s28), 31 }
  0x2a   : > { %s1332_s29 = sshll.u32 %s1994_s17, 2  ;;  %s1334_s9 = sshll.u32 %s1996_s28, 3 }
  0x2b   : > { %s1779_s8 = scalar_lea.vmem %s1976_s1, %s1332_s29  ;;  %s1336_s10 = sshll.u32 %s1996_s28, 2 }
  0x2c   : > { %s1784_s13 = scalar_lea.vmem %s1977_s2, %s1334_s9  ;;  %s1789_s15 = scalar_lea.vmem %s1980_s5, %s1336_s10 }
  0x2d   : > { %395 = sbr.rel (%p1337_p12) target bundleno = 67 (0x43), region = 85 }
  0x32   : > { %v1660_v16 = vmov 0.0  }
  0x33   : > { %396 = vst [vmem:[#allocation2 + $0x30] sm:$0xff] %v1660_v16  ;;  %397 = vst [vmem:[#allocation2] sm:$0xff] %v1660_v16 }
  0x34   : > { %398 = vst [vmem:[#allocation2 + $0x58] sm:$0xff] %v1660_v16  ;;  %399 = vst [vmem:[#allocation2 + $0x18] sm:$0xff] %v1660_v16 }
  0x35   : > { %400 = vst [vmem:[#allocation2 + $0x50] sm:$0xff] %v1660_v16  ;;  %401 = vst [vmem:[#allocation2 + $0x68] sm:$0xff] %v1660_v16 }
  0x36   : > { %402 = vst [vmem:[#allocation2 + $0x8] sm:$0xff] %v1660_v16  ;;  %403 = vst [vmem:[#allocation2 + $0x48] sm:$0xff] %v1660_v16 }
  0x37   : > { %404 = vst [vmem:[#allocation2 + $0x40] sm:$0xff] %v1660_v16  ;;  %405 = vst [vmem:[#allocation2 + $0x20] sm:$0xff] %v1660_v16 }
  0x38   : > { %406 = vst [vmem:[#allocation2 + $0x10] sm:$0xff] %v1660_v16  ;;  %407 = vst [vmem:[#allocation2 + $0x38] sm:$0xff] %v1660_v16 }
  0x39   : > { %408 = vst [vmem:[#allocation2 + $0x60] sm:$0xff] %v1660_v16  ;;  %409 = vst [vmem:[#allocation2 + $0x70] sm:$0xff] %v1660_v16 }
  0x3a   : > { %410 = vst [vmem:[#allocation2 + $0x78] sm:$0xff] %v1660_v16  ;;  %411 = vst [vmem:[#allocation2 + $0x28] sm:$0xff] %v1660_v16 }
  0x3b   : > { %412 = vst [vmem:[#allocation3 + $0x28] sm:$0xff] %v1660_v16  ;;  %413 = vst [vmem:[#allocation3 + $0x68] sm:$0xff] %v1660_v16 }
  0x3c   : > { %414 = vst [vmem:[#allocation3 + $0x10] sm:$0xff] %v1660_v16  ;;  %415 = vst [vmem:[#allocation3 + $0x40] sm:$0xff] %v1660_v16 }
  0x3d   : > { %416 = vst [vmem:[#allocation3 + $0x48] sm:$0xff] %v1660_v16  ;;  %417 = vst [vmem:[#allocation3 + $0x30] sm:$0xff] %v1660_v16 }
  0x3e   : > { %418 = vst [vmem:[#allocation3 + $0x70] sm:$0xff] %v1660_v16  ;;  %419 = vst [vmem:[#allocation3 + $0x38] sm:$0xff] %v1660_v16 }
  0x3f   : > { %420 = vst [vmem:[#allocation3 + $0x20] sm:$0xff] %v1660_v16  ;;  %421 = vst [vmem:[#allocation3 + $0x78] sm:$0xff] %v1660_v16 }
  0x40   : > { %422 = vst [vmem:[#allocation3 + $0x18] sm:$0xff] %v1660_v16  ;;  %423 = vst [vmem:[#allocation3 + $0x58] sm:$0xff] %v1660_v16 }
  0x41   : > { %424 = vst [vmem:[#allocation3] sm:$0xff] %v1660_v16  ;;  %425 = vst [vmem:[#allocation3 + $0x8] sm:$0xff] %v1660_v16 }
  0x42   : > { %426 = vst [vmem:[#allocation3 + $0x60] sm:$0xff] %v1660_v16  ;;  %427 = vst [vmem:[#allocation3 + $0x50] sm:$0xff] %v1660_v16 }
  0x43 PF: > { %v1562_v17 = vld [vmem:[%s1978_s3 + $0x74] ss:$8 sps:$4 sm:$0xff]   ;;  %v1564_v18 = vld [vmem:[%s1978_s3 + $0x70] ss:$8 sps:$4 sm:$0xff]   ;;  %v1661_v19 = vmov 0   ;;  %v1586_v34 = vld [vmem:[%s1779_s8] sm:$0xff]   ;;  %p1370_p13 = scmp.ne.s32.totalorder %s1642_s20, %s1646_s21 }
  0x44   : > { %620 = vmatprep.mubr.bf16.mxu0 %v1661_v19  ;;  %588 = vmatprep.subr.bf16.mxu0 %v1562_v17  ;;  %v1565_v20 = vld [vmem:[%s1978_s3 + $0x64] ss:$8 sps:$4 sm:$0xff]   ;;  %v1567_v21 = vld [vmem:[%s1978_s3 + $0x60] ss:$8 sps:$4 sm:$0xff]   ;;  %v1568_v22 = vld [vmem:[%s1978_s3 + $0x54] ss:$8 sps:$4 sm:$0xff]  }
  0x45   : > { %589 = vmatpush1.bf16.msra.mxu0 %v1564_v18  ;;  %v1570_v23 = vld [vmem:[%s1978_s3 + $0x50] ss:$8 sps:$4 sm:$0xff]   ;;  %v1571_v24 = vld [vmem:[%s1978_s3 + $0x44] ss:$8 sps:$4 sm:$0xff]   ;;  %v1573_v25 = vld [vmem:[%s1978_s3 + $0x40] ss:$8 sps:$4 sm:$0xff]  }
  0x46   : > { %590 = vmatprep.subr.bf16.mxu0 %v1565_v20  ;;  %v1574_v26 = vld [vmem:[%s1978_s3 + $0x34] ss:$8 sps:$4 sm:$0xff]   ;;  %v1576_v27 = vld [vmem:[%s1978_s3 + $0x30] ss:$8 sps:$4 sm:$0xff]   ;;  %v1577_v28 = vld [vmem:[%s1978_s3 + $0x24] ss:$8 sps:$4 sm:$0xff]  }
  0x47   : > { %v1579_v29 = vld [vmem:[%s1978_s3 + $0x20] ss:$8 sps:$4 sm:$0xff]   ;;  %v1580_v30 = vld [vmem:[%s1978_s3 + $0x14] ss:$8 sps:$4 sm:$0xff]   ;;  %v1582_v31 = vld [vmem:[%s1978_s3 + $0x10] ss:$8 sps:$4 sm:$0xff]  }
  0x48   : > { %v1583_v32 = vld [vmem:[%s1978_s3 + $0x4] ss:$8 sps:$4 sm:$0xff]   ;;  %v1585_v33 = vld [vmem:[%s1978_s3] ss:$8 sps:$4 sm:$0xff]   ;;  %v1588_v36 = vld [vmem:[%s1779_s8 + $0x10] sm:$0xff]  }
  0x49   : > { %591 = vmatpush1.bf16.msra.mxu0 %v1567_v21  ;;  %v1587_v35 = vld [vmem:[%s1779_s8 + $0x8] sm:$0xff]   ;;  %v1589_v37 = vld [vmem:[%s1779_s8 + $0x18] sm:$0xff]   ;;  %v1590_v38 = vld [vmem:[%s1779_s8 + $0x20] sm:$0xff]  }
  0x4a   : > { %592 = vmatprep.subr.bf16.mxu0 %v1568_v22  ;;  %v1591_v39 = vld [vmem:[%s1779_s8 + $0x28] sm:$0xff]   ;;  %v1592_v40 = vld [vmem:[%s1779_s8 + $0x30] sm:$0xff]   ;;  %v1593_v41 = vld [vmem:[%s1779_s8 + $0x38] sm:$0xff]  }
  0x4b   : > { %v1594_v42 = vld [vmem:[%s1791_s16] sm:$0xff]   ;;  %v1596_v20 = vld [vmem:[%s1791_s16 + $0x10] sm:$0xff]   ;;  %v1597_v21 = vld [vmem:[%s1791_s16 + $0x18] sm:$0xff]  }
  0x4c   : > { %1487 = vmatprep.mubr.bf16.mxu1 %v1594_v42  ;;  %v1598_v22 = vld [vmem:[%s1791_s16 + $0x20] sm:$0xff]  }
  0x4d   : > { %593 = vmatpush1.bf16.msra.mxu0 %v1570_v23  ;;  %v1599_v23 = vld [vmem:[%s1791_s16 + $0x28] sm:$0xff]  }
  0x4e   : > { %594 = vmatprep.subr.bf16.mxu0 %v1571_v24  ;;  %v1600_v24 = vld [vmem:[%s1791_s16 + $0x30] sm:$0xff]  }
  0x51   : > { %595 = vmatpush1.bf16.msra.mxu0 %v1573_v25  ;;  %v1601_v25 = vld [vmem:[%s1791_s16 + $0x38] sm:$0xff]  }
  0x52   : > { %596 = vmatprep.subr.bf16.mxu0 %v1574_v26  ;;  %v703_v26 = vld [vmem:[#allocation2 + $0x58] sm:$0xff] }
  0x55   : > { %597 = vmatpush1.bf16.msra.mxu0 %v1576_v27 }
  0x56   : > { %598 = vmatprep.subr.bf16.mxu0 %v1577_v28  ;;  %v701_v28 = vld [vmem:[#allocation2 + $0x30] sm:$0xff] }
  0x59   : > { %599 = vmatpush1.bf16.msra.mxu0 %v1579_v29 }
  0x5a   : > { %600 = vmatprep.subr.bf16.mxu0 %v1580_v30 }
  0x5d   : > { %601 = vmatpush1.bf16.msra.mxu0 %v1582_v31  ;;  %v704_v31 = vld [vmem:[#allocation2 + $0x18] sm:$0xff] }
  0x5e   : > { %602 = vmatprep.subr.bf16.mxu0 %v1583_v32 }
  0x61   : > { %603 = vmatpush1.bf16.msra.mxu0 %v1585_v33 }
  0x64   : > { %621 = vmatmul.mubr.bf16.vlgmr.msra.gmra.mxu0 %v1586_v34  ;;  %v702_v34 = vld [vmem:[#allocation2] sm:$0xff] }
  0x65   : > { %630 = vmatprep.mubr.bf16.mxu0 %v1661_v19 }
  0x6c   : > { %631 = vmatmul.mubr.bf16.gmra.mxu0 %v1587_v35 }
  0x6d   : > { %640 = vmatprep.mubr.bf16.mxu0 %v1661_v19 }
  0x74   : > { %641 = vmatmul.mubr.bf16.gmra.mxu0 %v1588_v36 }
  0x75   : > { %650 = vmatprep.mubr.bf16.mxu0 %v1661_v19 }
  0x7c   : > { %651 = vmatmul.mubr.bf16.gmra.mxu0 %v1589_v37  ;;  %v707_v37 = vld [vmem:[#allocation2 + $0x8] sm:$0xff] }
  0x7d   : > { %660 = vmatprep.mubr.bf16.mxu0 %v1661_v19 }
  0x84   : > { %661 = vmatmul.mubr.bf16.gmra.mxu0 %v1590_v38 }
  0x85   : > { %670 = vmatprep.mubr.bf16.mxu0 %v1661_v19 }
  0x8c   : > { %671 = vmatmul.mubr.bf16.gmra.mxu0 %v1591_v39 }
  0x8d   : > { %680 = vmatprep.mubr.bf16.mxu0 %v1661_v19 }
  0x94   : > { %681 = vmatmul.mubr.bf16.gmra.mxu0 %v1592_v40  ;;  %v705_v40 = vld [vmem:[#allocation2 + $0x50] sm:$0xff] }
  0x95   : > { %690 = vmatprep.mubr.bf16.mxu0 %v1661_v19  ;;  %v1595_v19 = vld [vmem:[%s1791_s16 + $0x8] sm:$0xff]  }
  0x9c   : > { %691 = vmatmul.mubr.bf16.gmra.mxu0 %v1593_v41 }
 0x124   : > { %v622_v43 = vpop.f32.mrf.mxu0 }
 0x126   : > { %v1851_v44 = vpop.f32.mrf.mxu0 }
 0x128   : > { %v626_v45 = vpop.f32.mrf.mxu0 }
 0x129   : > { %v733_v46 = vpack.c.bf16 %v626_v45, %v622_v43  ;;  %v708_v43 = vld [vmem:[#allocation2 + $0x48] sm:$0xff] }
 0x12a   : > { %v1853_v47 = vpop.f32.mrf.mxu0 }
 0x12c   : > { %v632_v48 = vpop.f32.mrf.mxu0 }
 0x12e   : > { %v1855_v49 = vpop.f32.mrf.mxu0 }
 0x130   : > { %v636_v50 = vpop.f32.mrf.mxu0 }
 0x131   : > { %v734_v51 = vpack.c.bf16 %v636_v50, %v632_v48  ;;  %v706_v48 = vld [vmem:[#allocation2 + $0x68] sm:$0xff] }
 0x132   : > { %v1857_v52 = vpop.f32.mrf.mxu0 }
 0x134   : > { %v642_v53 = vpop.f32.mrf.mxu0 }
 0x136   : > { %v1859_v54 = vpop.f32.mrf.mxu0 }
 0x138   : > { %v646_v55 = vpop.f32.mrf.mxu0 }
 0x139   : > { %v735_v18 = vpack.c.bf16 %v646_v55, %v642_v53  ;;  %v711_v53 = vld [vmem:[#allocation2 + $0x10] sm:$0xff] }
 0x13a   : > { %v1861_v56 = vpop.f32.mrf.mxu0 }
 0x13c   : > { %v652_v57 = vpop.f32.mrf.mxu0 }
 0x13e   : > { %v1863_v58 = vpop.f32.mrf.mxu0 }
 0x140   : > { %v656_v59 = vpop.f32.mrf.mxu0 }
 0x141   : > { %v736_v17 = vpack.c.bf16 %v656_v59, %v652_v57  ;;  %v709_v59 = vld [vmem:[#allocation2 + $0x40] sm:$0xff] }
 0x142   : > { %v1865_v60 = vpop.f32.mrf.mxu0 }
 0x144   : > { %v662_v61 = vpop.f32.mrf.mxu0 }
 0x146   : > { %v1867_v62 = vpop.f32.mrf.mxu0 }
 0x148   : > { %v666_v63 = vpop.f32.mrf.mxu0 }
 0x149   : > { %v737_v16 = vpack.c.bf16 %v666_v63, %v662_v61 }
 0x14a   : > { %v1869_v0 = vpop.f32.mrf.mxu0 }
 0x14c   : > { %v672_v1 = vpop.f32.mrf.mxu0 }
 0x14e   : > { %v1871_v2 = vpop.f32.mrf.mxu0 }
 0x150   : > { %v676_v3 = vpop.f32.mrf.mxu0 }
 0x151   : > { %v738_v15 = vpack.c.bf16 %v676_v3, %v672_v1  ;;  %v712_v1 = vld [vmem:[#allocation2 + $0x38] sm:$0xff] }
 0x152   : > { %v1873_v4 = vpop.f32.mrf.mxu0 }
 0x154   : > { %v682_v5 = vpop.f32.mrf.mxu0 }
 0x156   : > { %v1875_v6 = vpop.f32.mrf.mxu0 }
 0x158   : > { %v686_v7 = vpop.f32.mrf.mxu0 }
 0x159   : > { %v739_v14 = vpack.c.bf16 %v686_v7, %v682_v5  ;;  %v710_v7 = vld [vmem:[#allocation2 + $0x20] sm:$0xff] }
 0x15a   : > { %v1877_v8 = vpop.f32.mrf.mxu0 }
 0x15c   : > { %v692_v9 = vpop.f32.mrf.mxu0 }
 0x15e   : > { %v1879_v10 = vpop.f32.mrf.mxu0 }
 0x160   : > { %v696_v11 = vpop.f32.mrf.mxu0 }
 0x161   : > { %v740_v12 = vpack.c.bf16 %v696_v11, %v692_v9 }
 0x162   : > { %v1881_v13 = vpop.f32.mrf.mxu0 }
 0x163   : > { %1471 = vmatprep.subr.bf16.mxu1 %v740_v12 }
 0x164   : > { %1472 = vmatpush3.bf16.msra.mxu1 %v740_v12  ;;  %v715_v12 = vld [vmem:[#allocation2 + $0x78] sm:$0xff] }
 0x165   : > { %1473 = vmatprep.subr.bf16.mxu1 %v739_v14 }
 0x168   : > { %1474 = vmatpush3.bf16.msra.mxu1 %v739_v14 }
 0x169   : > { %1475 = vmatprep.subr.bf16.mxu1 %v738_v15 }
 0x16c   : > { %1476 = vmatpush3.bf16.msra.mxu1 %v738_v15 }
 0x16d   : > { %1477 = vmatprep.subr.bf16.mxu1 %v737_v16 }
 0x170   : > { %1478 = vmatpush3.bf16.msra.mxu1 %v737_v16  ;;  %v713_v16 = vld [vmem:[#allocation2 + $0x60] sm:$0xff] }
 0x171   : > { %1479 = vmatprep.subr.bf16.mxu1 %v736_v17 }
 0x174   : > { %1480 = vmatpush3.bf16.msra.mxu1 %v736_v17 }
 0x175   : > { %1481 = vmatprep.subr.bf16.mxu1 %v735_v18 }
 0x178   : > { %1482 = vmatpush3.bf16.msra.mxu1 %v735_v18 }
 0x179   : > { %1483 = vmatprep.subr.bf16.mxu1 %v734_v51 }
 0x17c   : > { %1484 = vmatpush3.bf16.msra.mxu1 %v734_v51 }
 0x17d   : > { %1485 = vmatprep.subr.bf16.mxu1 %v733_v46 }
 0x180   : > { %1486 = vmatpush3.bf16.msra.mxu1 %v733_v46 }
 0x183   : > { %1488 = vmatmul.mubr.bf16.vlgmr.msra.gmra.mxu1 %v1595_v19  ;;  %v716_v19 = vld [vmem:[#allocation2 + $0x28] sm:$0xff] }
 0x184   : > { %1491 = vmatprep.mubr.bf16.mxu1 %v1596_v20 }
 0x18b   : > { %1492 = vmatmul.mubr.bf16.gmra.mxu1 %v1597_v21 }
 0x18c   : > { %1495 = vmatprep.mubr.bf16.mxu1 %v1598_v22  ;;  %v714_v22 = vld [vmem:[#allocation2 + $0x70] sm:$0xff] }
 0x193   : > { %1496 = vmatmul.mubr.bf16.gmra.mxu1 %v1599_v23 }
 0x194   : > { %1499 = vmatprep.mubr.bf16.mxu1 %v1600_v24 }
 0x19b   : > { %1500 = vmatmul.mubr.bf16.gmra.mxu1 %v1601_v25 }
 0x243   : > { %v1489_v27 = vpop.f32.mrf.mxu1 }
 0x244   : > { %v888_v29 = vadd.f32 %v1489_v27, %v703_v26 }
 0x245   : > { %v823_v30 = vpop.f32.mrf.mxu1 }
 0x246   : > { %904 = vst [vmem:[#allocation2 + $0x58] sm:$0xff] %v888_v29  ;;  %v886_v32 = vadd.f32 %v823_v30, %v701_v28 }
 0x247   : > { %v1490_v33 = vpop.f32.mrf.mxu1 }
 0x248   : > { %902 = vst [vmem:[#allocation2 + $0x30] sm:$0xff] %v886_v32  ;;  %v889_v35 = vadd.f32 %v1490_v33, %v704_v31 }
 0x249   : > { %v826_v36 = vpop.f32.mrf.mxu1 }
 0x24a   : > { %905 = vst [vmem:[#allocation2 + $0x18] sm:$0xff] %v889_v35  ;;  %v887_v38 = vadd.f32 %v826_v36, %v702_v34 }
 0x24b   : > { %v1493_v39 = vpop.f32.mrf.mxu1 }
 0x24c   : > { %903 = vst [vmem:[#allocation2] sm:$0xff] %v887_v38  ;;  %v892_v41 = vadd.f32 %v1493_v39, %v707_v37 }
 0x24d   : > { %v839_v42 = vpop.f32.mrf.mxu1 }
 0x24e   : > { %908 = vst [vmem:[#allocation2 + $0x8] sm:$0xff] %v892_v41  ;;  %v890_v45 = vadd.f32 %v839_v42, %v705_v40 }
 0x24f   : > { %v1494_v46 = vpop.f32.mrf.mxu1 }
 0x250   : > { %906 = vst [vmem:[#allocation2 + $0x50] sm:$0xff] %v890_v45  ;;  %v893_v50 = vadd.f32 %v1494_v46, %v708_v43 }
 0x251   : > { %v842_v51 = vpop.f32.mrf.mxu1 }
 0x252   : > { %909 = vst [vmem:[#allocation2 + $0x48] sm:$0xff] %v893_v50  ;;  %v891_v55 = vadd.f32 %v842_v51, %v706_v48 }
 0x253   : > { %v1497_v57 = vpop.f32.mrf.mxu1 }
 0x254   : > { %907 = vst [vmem:[#allocation2 + $0x68] sm:$0xff] %v891_v55  ;;  %v896_v61 = vadd.f32 %v1497_v57, %v711_v53 }
 0x255   : > { %v855_v63 = vpop.f32.mrf.mxu1 }
 0x256   : > { %912 = vst [vmem:[#allocation2 + $0x10] sm:$0xff] %v896_v61  ;;  %v894_v3 = vadd.f32 %v855_v63, %v709_v59 }
 0x257   : > { %v1498_v5 = vpop.f32.mrf.mxu1 }
 0x258   : > { %910 = vst [vmem:[#allocation2 + $0x40] sm:$0xff] %v894_v3  ;;  %v897_v9 = vadd.f32 %v1498_v5, %v712_v1 }
 0x259   : > { %v858_v11 = vpop.f32.mrf.mxu1 }
 0x25a   : > { %913 = vst [vmem:[#allocation2 + $0x38] sm:$0xff] %v897_v9  ;;  %v895_v14 = vadd.f32 %v858_v11, %v710_v7 }
 0x25b   : > { %v1501_v15 = vpop.f32.mrf.mxu1 }
 0x25c   : > { %911 = vst [vmem:[#allocation2 + $0x20] sm:$0xff] %v895_v14  ;;  %v900_v17 = vadd.f32 %v1501_v15, %v715_v12 }
 0x25d   : > { %v871_v18 = vpop.f32.mrf.mxu1 }
 0x25e   : > { %916 = vst [vmem:[#allocation2 + $0x78] sm:$0xff] %v900_v17  ;;  %v898_v20 = vadd.f32 %v871_v18, %v713_v16 }
 0x25f   : > { %v1502_v21 = vpop.f32.mrf.mxu1 }
 0x260   : > { %914 = vst [vmem:[#allocation2 + $0x60] sm:$0xff] %v898_v20  ;;  %v901_v23 = vadd.f32 %v1502_v21, %v716_v19  ;;  %921 = sbr.rel (%p1370_p13) target bundleno = 621 (0x26d), region = 89 }
 0x261   : > { %v874_v24 = vpop.f32.mrf.mxu1 }
 0x262   : > { %917 = vst [vmem:[#allocation2 + $0x28] sm:$0xff] %v901_v23  ;;  %v899_v25 = vadd.f32 %v874_v24, %v714_v22 }
 0x264   : > { %915 = vst [vmem:[#allocation2 + $0x70] sm:$0xff] %v899_v25 }
 0x265   : > { %922 = vst [vmem:[#allocation3 + $0x28] sm:$0xff] %v1851_v44  ;;  %923 = vst [vmem:[#allocation3 + $0x68] sm:$0xff] %v1853_v47 }
 0x266   : > { %924 = vst [vmem:[#allocation3 + $0x10] sm:$0xff] %v1855_v49  ;;  %925 = vst [vmem:[#allocation3 + $0x40] sm:$0xff] %v1857_v52 }
 0x267   : > { %926 = vst [vmem:[#allocation3 + $0x48] sm:$0xff] %v1859_v54  ;;  %927 = vst [vmem:[#allocation3 + $0x30] sm:$0xff] %v1861_v56 }
 0x268   : > { %928 = vst [vmem:[#allocation3 + $0x70] sm:$0xff] %v1863_v58  ;;  %929 = vst [vmem:[#allocation3 + $0x38] sm:$0xff] %v1865_v60 }
 0x269   : > { %930 = vst [vmem:[#allocation3 + $0x20] sm:$0xff] %v1867_v62  ;;  %931 = vst [vmem:[#allocation3 + $0x78] sm:$0xff] %v1869_v0 }
 0x26a   : > { %932 = vst [vmem:[#allocation3 + $0x18] sm:$0xff] %v1871_v2  ;;  %933 = vst [vmem:[#allocation3 + $0x58] sm:$0xff] %v1873_v4 }
 0x26b   : > { %934 = vst [vmem:[#allocation3] sm:$0xff] %v1875_v6  ;;  %935 = vst [vmem:[#allocation3 + $0x8] sm:$0xff] %v1877_v8 }
 0x26c   : > { %936 = vst [vmem:[#allocation3 + $0x60] sm:$0xff] %v1879_v10  ;;  %937 = vst [vmem:[#allocation3 + $0x50] sm:$0xff] %v1881_v13 }
 0x26d PF: > { %p1371_p0 = scmp.ne.s32.totalorder %s1642_s20, 1 }
 0x26f   : > { %941 = sbr.rel (%p1371_p0) target bundleno = 793 (0x319), region = 93 }
 0x274   : > { %v960_v44 = vld [vmem:[%s1784_s13 + $0x10] sm:$0xff]  ;;  %v958_v47 = vld [vmem:[%s1784_s13] sm:$0xff]  ;;  %v1662_v49 = vmov 0   ;;  %v961_v52 = vld [vmem:[%s1784_s13 + $0x18] sm:$0xff] }
 0x275   : > { %1603 = vset.pattern.permute.xlu1 %v1662_v49  ;;  %1602 = vset.pattern.permute.xlu0 %v1662_v49  ;;  %v959_v54 = vld [vmem:[%s1784_s13 + $0x8] sm:$0xff]  ;;  %v962_v58 = vld [vmem:[%s1784_s13 + $0x20] sm:$0xff]  ;;  %v965_v60 = vld [vmem:[%s1784_s13 + $0x38] sm:$0xff] }
 0x276   : > { %986 = vperm.xlu1 %1603, %v960_v44   ;;  %976 = vperm.xlu0 %1602, %v958_v47   ;;  %v963_v56 = vld [vmem:[%s1784_s13 + $0x28] sm:$0xff]  ;;  %v964_v62 = vld [vmem:[%s1784_s13 + $0x30] sm:$0xff]  ;;  %v966_v2 = vld [vmem:[%s1784_s13 + $0x40] sm:$0xff] }
 0x277   : > { %v967_v0 = vld [vmem:[%s1784_s13 + $0x48] sm:$0xff]  ;;  %v969_v4 = vld [vmem:[%s1784_s13 + $0x58] sm:$0xff]  ;;  %v968_v6 = vld [vmem:[%s1784_s13 + $0x50] sm:$0xff] }
 0x278   : > { %v971_v8 = vld [vmem:[%s1784_s13 + $0x68] sm:$0xff]  ;;  %v970_v10 = vld [vmem:[%s1784_s13 + $0x60] sm:$0xff]  ;;  %v973_v13 = vld [vmem:[%s1784_s13 + $0x78] sm:$0xff] }
 0x279   : > { %v972_v26 = vld [vmem:[%s1784_s13 + $0x70] sm:$0xff]  ;;  %v944_v27 = vld [vmem:[#allocation2 + $0x58] sm:$0xff]  ;;  %v1070_v31 = vld [vmem:[#allocation3 + $0x28] sm:$0xff] }
 0x27a   : > { %991 = vperm.xlu1 %1603, %v961_v52   ;;  %981 = vperm.xlu0 %1602, %v959_v54   ;;  %v942_v28 = vld [vmem:[#allocation2 + $0x30] sm:$0xff]  ;;  %v945_v35 = vld [vmem:[#allocation2 + $0x18] sm:$0xff]  ;;  %v943_v36 = vld [vmem:[#allocation2] sm:$0xff] }
 0x27b   : > { %v1072_v29 = vld [vmem:[#allocation3 + $0x10] sm:$0xff]  ;;  %v1928_v37 = vld [vmem:[%s1979_s4] ss:$0 sm:$0xff]  ;;  %v1071_v42 = vld [vmem:[#allocation3 + $0x68] sm:$0xff] }
 0x27c   : > { %v1073_v40 = vld [vmem:[#allocation3 + $0x40] sm:$0xff]  ;;  %v947_v51 = vld [vmem:[#allocation2 + $0x68] sm:$0xff]  ;;  %v946_v53 = vld [vmem:[#allocation2 + $0x50] sm:$0xff] }
 0x27d   : > { %v1075_v59 = vld [vmem:[#allocation3 + $0x30] sm:$0xff]  ;;  %v1074_v63 = vld [vmem:[#allocation3 + $0x48] sm:$0xff]  ;;  %v1077_v44 = vld [vmem:[#allocation3 + $0x38] sm:$0xff] }
 0x27e   : > { %1001 = vperm.xlu1 %1603, %v963_v56   ;;  %996 = vperm.xlu0 %1602, %v962_v58   ;;  %v949_v18 = vld [vmem:[#allocation2 + $0x48] sm:$0xff]  ;;  %v1076_v47 = vld [vmem:[#allocation3 + $0x70] sm:$0xff]  ;;  %v951_v54 = vld [vmem:[#allocation2 + $0x20] sm:$0xff] }
 0x27f   : > { %v948_v19 = vld [vmem:[#allocation2 + $0x8] sm:$0xff]  ;;  %v950_v56 = vld [vmem:[#allocation2 + $0x40] sm:$0xff] }
 0x282   : > { %1011 = vperm.xlu1 %1603, %v965_v60   ;;  %1006 = vperm.xlu0 %1602, %v964_v62  }
 0x286   : > { %1021 = vperm.xlu1 %1603, %v967_v0   ;;  %1016 = vperm.xlu0 %1602, %v966_v2   ;;  %v1079_v2 = vld [vmem:[#allocation3 + $0x78] sm:$0xff] }
 0x28a   : > { %1031 = vperm.xlu1 %1603, %v969_v4   ;;  %1026 = vperm.xlu0 %1602, %v968_v6   ;;  %v1078_v6 = vld [vmem:[#allocation3 + $0x20] sm:$0xff] }
 0x28e   : > { %1041 = vperm.xlu1 %1603, %v971_v8   ;;  %1036 = vperm.xlu0 %1602, %v970_v10  }
 0x292   : > { %1051 = vperm.xlu1 %1603, %v973_v13   ;;  %1046 = vperm.xlu0 %1602, %v972_v26  }
 0x2f1   : > { %v987_v30 = vpop.permute.xlu1 %986  ;;  %v977_v32 = vpop.permute.xlu0 %976 }
 0x2f2   : > { %v1056_v33 = vmul.f32 %v987_v30, %v944_v27  ;;  %v1054_v34 = vmul.f32 %v977_v32, %v942_v28  ;;  %v952_v30 = vld [vmem:[#allocation2 + $0x10] sm:$0xff] }
 0x2f4   : > { %v1088_v38 = vadd.f32 %v1072_v29, %v1056_v33  ;;  %v1086_v39 = vadd.f32 %v1070_v31, %v1054_v34  ;;  %v953_v29 = vld [vmem:[#allocation2 + $0x38] sm:$0xff] }
 0x2f5   : > { %v992_v41 = vpop.permute.xlu1 %991  ;;  %v982_v43 = vpop.permute.xlu0 %981 }
 0x2f6   : > { %v1057_v45 = vmul.f32 %v992_v41, %v945_v35  ;;  %v1055_v46 = vmul.f32 %v982_v43, %v943_v36  ;;  %v1111_v48 = vadd.f32 %v1928_v37, %v1088_v38  ;;  %v1109_v50 = vadd.f32 %v1928_v37, %v1086_v39  ;;  %v1081_v35 = vld [vmem:[#allocation3 + $0x58] sm:$0xff] }
 0x2f7   : > { %v1080_v38 = vld [vmem:[#allocation3 + $0x18] sm:$0xff] }
 0x2f8   : > { %v1089_v55 = vadd.f32 %v1073_v40, %v1057_v45  ;;  %v1087_v57 = vadd.f32 %v1071_v42, %v1055_v46  ;;  %v1127_v11 = vmax.f32 %v1111_v48, 0.0  ;;  %v1125_v12 = vmax.f32 %v1109_v50, 0.0  ;;  %v955_v46 = vld [vmem:[#allocation2 + $0x70] sm:$0xff] }
 0x2f9   : > { %v1002_v61 = vpop.permute.xlu1 %1001  ;;  %v997_v1 = vpop.permute.xlu0 %996 }
 0x2fa   : > { %v1112_v3 = vadd.f32 %v1928_v37, %v1089_v55  ;;  %v1110_v5 = vadd.f32 %v1928_v37, %v1087_v57  ;;  %v1059_v7 = vmul.f32 %v1002_v61, %v947_v51  ;;  %v1058_v9 = vmul.f32 %v997_v1, %v946_v53  ;;  %v954_v55 = vld [vmem:[#allocation2 + $0x60] sm:$0xff]  ;;  %v1083_v57 = vld [vmem:[#allocation3 + $0x8] sm:$0xff] }
 0x2fc   : > { %v1128_v14 = vmax.f32 %v1112_v3, 0.0  ;;  %v1126_v15 = vmax.f32 %v1110_v5, 0.0  ;;  %v1091_v16 = vadd.f32 %v1075_v59, %v1059_v7  ;;  %v1090_v17 = vadd.f32 %v1074_v63, %v1058_v9  ;;  %v1082_v7 = vld [vmem:[#allocation3] sm:$0xff] }
 0x2fd   : > { %v1012_v20 = vpop.permute.xlu1 %1011  ;;  %v1007_v21 = vpop.permute.xlu0 %1006 }
 0x2fe   : > { %v1416_v22 = vpack.c.bf16 %v1128_v14, %v1127_v11  ;;  %v1411_v23 = vpack.c.bf16 %v1126_v15, %v1125_v12  ;;  %v1114_v24 = vadd.f32 %v1928_v37, %v1091_v16  ;;  %v1113_v25 = vadd.f32 %v1928_v37, %v1090_v17  ;;  %v957_v11 = vld [vmem:[#allocation2 + $0x28] sm:$0xff]  ;;  %v956_v12 = vld [vmem:[#allocation2 + $0x78] sm:$0xff] }
 0x2ff   : > { %v1061_v49 = vmul.f32 %v1012_v20, %v949_v18  ;;  %v1060_v52 = vmul.f32 %v1007_v21, %v948_v19  ;;  %v1085_v18 = vld [vmem:[#allocation3 + $0x50] sm:$0xff]  ;;  %v1084_v20 = vld [vmem:[#allocation3 + $0x60] sm:$0xff] }
 0x300   : > { %1448 = vst [vmem:[%s1789_s15 + $0x8] sm:$0xff] %v1416_v22   ;;  %1412 = vst [vmem:[%s1789_s15] sm:$0xff] %v1411_v23   ;;  %v1130_v58 = vmax.f32 %v1114_v24, 0.0  ;;  %v1129_v60 = vmax.f32 %v1113_v25, 0.0 }
 0x301   : > { %v1093_v62 = vadd.f32 %v1077_v44, %v1061_v49  ;;  %v1092_v0 = vadd.f32 %v1076_v47, %v1060_v52  ;;  %v1022_v4 = vpop.permute.xlu1 %1021  ;;  %v1017_v8 = vpop.permute.xlu0 %1016 }
 0x302   : > { %v1421_v10 = vpack.c.bf16 %v1130_v58, %v1129_v60  ;;  %v1063_v13 = vmul.f32 %v1022_v4, %v951_v54  ;;  %v1062_v26 = vmul.f32 %v1017_v8, %v950_v56 }
 0x303   : > { %v1116_v27 = vadd.f32 %v1928_v37, %v1093_v62  ;;  %v1115_v28 = vadd.f32 %v1928_v37, %v1092_v0 }
 0x304   : > { %1449 = vst [vmem:[%s1789_s15 + $0x10] sm:$0xff] %v1421_v10   ;;  %v1095_v31 = vadd.f32 %v1079_v2, %v1063_v13  ;;  %v1094_v32 = vadd.f32 %v1078_v6, %v1062_v26 }
 0x305   : > { %v1132_v33 = vmax.f32 %v1116_v27, 0.0  ;;  %v1131_v34 = vmax.f32 %v1115_v28, 0.0  ;;  %v1032_v36 = vpop.permute.xlu1 %1031  ;;  %v1027_v39 = vpop.permute.xlu0 %1026 }
 0x306   : > { %v1118_v40 = vadd.f32 %v1928_v37, %v1095_v31  ;;  %v1117_v41 = vadd.f32 %v1928_v37, %v1094_v32  ;;  %v1065_v42 = vmul.f32 %v1032_v36, %v953_v29  ;;  %v1064_v43 = vmul.f32 %v1027_v39, %v952_v30 }
 0x307   : > { %v1426_v45 = vpack.c.bf16 %v1132_v33, %v1131_v34 }
 0x308   : > { %v1134_v48 = vmax.f32 %v1118_v40, 0.0  ;;  %v1133_v50 = vmax.f32 %v1117_v41, 0.0  ;;  %v1097_v51 = vadd.f32 %v1081_v35, %v1065_v42  ;;  %v1096_v53 = vadd.f32 %v1080_v38, %v1064_v43 }
 0x309   : > { %1450 = vst [vmem:[%s1789_s15 + $0x18] sm:$0xff] %v1426_v45   ;;  %v1042_v59 = vpop.permute.xlu1 %1041  ;;  %v1037_v61 = vpop.permute.xlu0 %1036 }
 0x30a   : > { %v1431_v63 = vpack.c.bf16 %v1134_v48, %v1133_v50  ;;  %v1120_v1 = vadd.f32 %v1928_v37, %v1097_v51  ;;  %v1119_v3 = vadd.f32 %v1928_v37, %v1096_v53  ;;  %v1067_v5 = vmul.f32 %v1042_v59, %v955_v46 }
 0x30b   : > { %v1066_v9 = vmul.f32 %v1037_v61, %v954_v55 }
 0x30c   : > { %1451 = vst [vmem:[%s1789_s15 + $0x20] sm:$0xff] %v1431_v63   ;;  %v1136_v14 = vmax.f32 %v1120_v1, 0.0  ;;  %v1135_v15 = vmax.f32 %v1119_v3, 0.0  ;;  %v1099_v16 = vadd.f32 %v1083_v57, %v1067_v5 }
 0x30d   : > { %v1098_v17 = vadd.f32 %v1082_v7, %v1066_v9  ;;  %v1052_v19 = vpop.permute.xlu1 %1051  ;;  %v1047_v21 = vpop.permute.xlu0 %1046 }
 0x30e   : > { %v1436_v22 = vpack.c.bf16 %v1136_v14, %v1135_v15  ;;  %v1122_v23 = vadd.f32 %v1928_v37, %v1099_v16  ;;  %v1069_v24 = vmul.f32 %v1052_v19, %v957_v11  ;;  %v1068_v25 = vmul.f32 %v1047_v21, %v956_v12 }
 0x30f   : > { %v1121_v44 = vadd.f32 %v1928_v37, %v1098_v17 }
 0x310   : > { %1452 = vst [vmem:[%s1789_s15 + $0x28] sm:$0xff] %v1436_v22   ;;  %v1138_v47 = vmax.f32 %v1122_v23, 0.0  ;;  %v1101_v49 = vadd.f32 %v1085_v18, %v1069_v24  ;;  %v1100_v52 = vadd.f32 %v1084_v20, %v1068_v25 }
 0x311   : > { %v1137_v54 = vmax.f32 %v1121_v44, 0.0 }
 0x312   : > { %v1124_v56 = vadd.f32 %v1928_v37, %v1101_v49  ;;  %v1123_v58 = vadd.f32 %v1928_v37, %v1100_v52 }
 0x313   : > { %v1441_v60 = vpack.c.bf16 %v1138_v47, %v1137_v54 }
 0x314   : > { %v1140_v62 = vmax.f32 %v1124_v56, 0.0  ;;  %v1139_v0 = vmax.f32 %v1123_v58, 0.0 }
 0x315   : > { %1453 = vst [vmem:[%s1789_s15 + $0x30] sm:$0xff] %v1441_v60  }
 0x316   : > { %v1446_v2 = vpack.c.bf16 %v1140_v62, %v1139_v0 }
 0x318   : > { %1454 = vst [vmem:[%s1789_s15 + $0x38] sm:$0xff] %v1446_v2  }
 0x319 PF: > { %s15_s24 = sadd.s32 1, %s1658_s24   ;;  %s1981_s18 = smov %s1638_s19 }
 0x31a   : > { %p12_p1 = scmp.ge.s32.totalorder %s15_s24, 6   ;;  %s1982_s19 = smov %s1744_s6 }
 0x31b   : > { %s1983_s20 = smov %s1650_s22  ;;  %s1984_s21 = smov %s1654_s23 }
 0x31c   : > { %s1985_s22 = smov %s1988_s25  ;;  %s1986_s23 = smov %s1992_s26 }
 0x31d   :  { %14 = sbr.rel (!%p12_p1) target bundleno = 4 (0x4), region = 134 }

// kernel: sage_forward.3
= control target key start
LH: loop header
LB: loop body
LE: loop exit
PB: predicated region body
PF: predicated region fallthrough
CT: control target
= control target key end

     0   :  { %s2128_s21 = smov 0   ;;  %s2130_s22 = smov 0   ;;  %s2673_s0 = inlined_call_operand.vmem [shape: bf16[128,256], index: 0, kind: input, shape index: {}]   ;;  %s2674_s1 = inlined_call_operand.vmem [shape: bf16[256,128], index: 1, kind: input, shape index: {}, may-alias: {1,2}]   ;;  %s2675_s2 = inlined_call_operand.vmem [shape: bf16[256,128], index: 2, kind: input, shape index: {}, may-alias: {1,2}]   ;;  %s2676_s3 = inlined_call_operand.vmem [shape: f32[128,1], index: 3, kind: input, shape index: {}]   ;;  %s2677_s4 = inlined_call_operand.vmem [shape: bf16[256,128], index: 4, kind: input, shape index: {}]   ;;  %s2678_s5 = inlined_call_operand.vmem [shape: f32[1,128], index: 5, kind: input, shape index: {}]   ;;  %s2679_s6 = inlined_call_operand.vmem [shape: f32[128,128], index: 6, kind: output, shape index: {}]  }
   0x1   :  { %s2132_s23 = smov 0   ;;  %s2134_s24 = smov 0  }
   0x2   :  { %s2136_s25 = smov 0  }
   0x3 LB: > { %s25_s26 = sadd.s32 1, %s2085_s24  ;;  %p44_p1 = scmp.ne.s32.totalorder %s2077_s22, %s2073_s21  ;;  %s2089_s25 = sphi %s2136_s25, %s16_s25   ;;  %s2085_s24 = sphi %s2134_s24, %s2683_s24   ;;  %s2081_s23 = sphi %s2132_s23, %s2682_s23   ;;  %s2077_s22 = sphi %s2130_s22, %s2681_s22   ;;  %s2073_s21 = sphi %s2128_s21, %s2680_s21  }
   0x4   : > { %p26_p0 = scmp.ge.s32.totalorder %s25_s26, 2  ;;  %p45_p2 = scmp.eq.s32.totalorder %s2089_s25, 0 }
   0x5   : > { %s37_s28 = sadd.s32 1, %s2077_s22  ;;  %p1649_p5 = scmp.ge.s32.totalorder %s2089_s25, 2 }
   0x6   : > { %s2685_s26 = smov (%p26_p0, %s25_s26), 0  ;;  %p46_p3 = por %p45_p2, %p44_p1 }
   0x7   : > { %s33_s27 = ssub.s32 %s2085_s24, %s2685_s26  ;;  %240 = sbr.rel (%p1649_p5) target bundleno = 26 (0x1a), region = 32 }
   0x8   : > { %p35_p4 = scmp.eq.s32.totalorder %s33_s27, 0 }
   0xa   : > { %s2163_s29 = scalar_select %p35_p4, %s2077_s22, %s37_s28  }
   0xc   : > { %243 = sbr.rel (!%p46_p3) target bundleno = 26 (0x1a), region = 36  ;;  %s245_s30 = sand.u32 (%p46_p3), 1, %s2077_s22  }
   0xd   : > { %s1651_s7 = sshll.u32 (%p46_p3), %s2085_s24, 2  ;;  %s1650_s8 = sshll.u32 (%p46_p3), %s245_s30, 6 }
   0xe   : > { %s2171_s11 = scalar_lea.vmem (%p46_p3), %s2673_s0, %s1651_s7  ;;  %s247_s12 = scalar_lea.vmem (%p46_p3), [#allocation4], %s1650_s8 }
   0xf   : > { %v269_v0 = vld [vmem:[%s2171_s11] sm:$0xf] (%p46_p3)  ;;  %v271_v1 = vld [vmem:[%s2171_s11 + $0x8] sm:$0xf] (%p46_p3)  ;;  %v273_v2 = vld [vmem:[%s2171_s11 + $0x10] sm:$0xf] (%p46_p3) }
  0x10   : > { %270 = vst [vmem:[%s247_s12] sm:$0xf] (%p46_p3), %v269_v0  ;;  %272 = vst [vmem:[%s247_s12 + $0x4] sm:$0xf] (%p46_p3), %v271_v1  ;;  %v275_v3 = vld [vmem:[%s2171_s11 + $0x18] sm:$0xf] (%p46_p3) }
  0x11   : > { %v277_v4 = vld [vmem:[%s2171_s11 + $0x20] sm:$0xf]  ;;  %274 = vst [vmem:[%s247_s12 + $0x8] sm:$0xf] %v273_v2  ;;  %276 = vst [vmem:[%s247_s12 + $0xc] sm:$0xf] %v275_v3 }
  0x12   : > { %278 = vst [vmem:[%s247_s12 + $0x10] sm:$0xf] %v277_v4  ;;  %v279_v5 = vld [vmem:[%s2171_s11 + $0x28] sm:$0xf]  ;;  %v281_v6 = vld [vmem:[%s2171_s11 + $0x30] sm:$0xf] }
  0x13   : > { %v283_v7 = vld [vmem:[%s2171_s11 + $0x38] sm:$0xf]  ;;  %280 = vst [vmem:[%s247_s12 + $0x14] sm:$0xf] %v279_v5  ;;  %282 = vst [vmem:[%s247_s12 + $0x18] sm:$0xf] %v281_v6 }
  0x14   : > { %284 = vst [vmem:[%s247_s12 + $0x1c] sm:$0xf] %v283_v7  ;;  %v285_v8 = vld [vmem:[%s2171_s11 + $0x40] sm:$0xf]  ;;  %v287_v9 = vld [vmem:[%s2171_s11 + $0x48] sm:$0xf] }
  0x15   : > { %v289_v10 = vld [vmem:[%s2171_s11 + $0x50] sm:$0xf]  ;;  %286 = vst [vmem:[%s247_s12 + $0x20] sm:$0xf] %v285_v8  ;;  %288 = vst [vmem:[%s247_s12 + $0x24] sm:$0xf] %v287_v9 }
  0x16   : > { %290 = vst [vmem:[%s247_s12 + $0x28] sm:$0xf] %v289_v10  ;;  %v291_v11 = vld [vmem:[%s2171_s11 + $0x58] sm:$0xf]  ;;  %v293_v12 = vld [vmem:[%s2171_s11 + $0x60] sm:$0xf] }
  0x17   : > { %v295_v13 = vld [vmem:[%s2171_s11 + $0x68] sm:$0xf]  ;;  %292 = vst [vmem:[%s247_s12 + $0x2c] sm:$0xf] %v291_v11  ;;  %294 = vst [vmem:[%s247_s12 + $0x30] sm:$0xf] %v293_v12 }
  0x18   : > { %296 = vst [vmem:[%s247_s12 + $0x34] sm:$0xf] %v295_v13  ;;  %v297_v14 = vld [vmem:[%s2171_s11 + $0x70] sm:$0xf]  ;;  %v299_v15 = vld [vmem:[%s2171_s11 + $0x78] sm:$0xf] }
  0x19   : > { %298 = vst [vmem:[%s247_s12 + $0x38] sm:$0xf] %v297_v14  ;;  %300 = vst [vmem:[%s247_s12 + $0x3c] sm:$0xf] %v299_v15 }
  0x1a PF: > { %p1652_p6 = scmp.ge.s32.totalorder %s2089_s25, 1  ;;  %p364_p7 = scmp.lt.s32.totalorder %s2089_s25, 3 }
  0x1c   : > { %p365_p8 = pnand %p1652_p6, %p364_p7 }
  0x1d   : > { %s371_s13 = sand.u32 (!%p365_p8), 1, %s2073_s21   ;;  %s1654_s14 = sshll.u32 (!%p365_p8), %s2081_s23, 4 }
  0x1e   : > { %368 = sbr.rel (%p365_p8) target bundleno = 982 (0x3d6), region = 81  ;;  %s1653_s15 = sshll.u32 (!%p365_p8), %s371_s13, 6 }
  0x1f   : > { %p417_p9 = scmp.lt.s32.totalorder (!%p365_p8), %s1654_s14, 31  ;;  %s2198_s20 = scalar_lea.vmem (!%p365_p8), [#allocation4], %s1653_s15 }
  0x20   : > { %p1656_p10 = scmp.ne.s32.totalorder (!%p365_p8), %s2081_s23, 0 }
  0x23   : > { %s2687_s14 = smov (!%p417_p9, %s1654_s14), 31  ;;  %444 = sbr.rel (%p1656_p10) target bundleno = 49 (0x31), region = 89 }
  0x24   : > { %s1655_s16 = sshll.u32 %s2687_s14, 2 }
  0x25   : > { %s2196_s19 = scalar_lea.vmem %s2674_s1, %s1655_s16 }
  0x28   : > { %v2091_v16 = vmov 0.0  }
  0x29   : > { %445 = vst [vmem:[#allocation2 + $0x30] sm:$0xff] %v2091_v16  ;;  %446 = vst [vmem:[#allocation2] sm:$0xff] %v2091_v16 }
  0x2a   : > { %447 = vst [vmem:[#allocation2 + $0x58] sm:$0xff] %v2091_v16  ;;  %448 = vst [vmem:[#allocation2 + $0x18] sm:$0xff] %v2091_v16 }
  0x2b   : > { %449 = vst [vmem:[#allocation2 + $0x50] sm:$0xff] %v2091_v16  ;;  %450 = vst [vmem:[#allocation2 + $0x68] sm:$0xff] %v2091_v16 }
  0x2c   : > { %451 = vst [vmem:[#allocation2 + $0x8] sm:$0xff] %v2091_v16  ;;  %452 = vst [vmem:[#allocation2 + $0x48] sm:$0xff] %v2091_v16 }
  0x2d   : > { %453 = vst [vmem:[#allocation2 + $0x40] sm:$0xff] %v2091_v16  ;;  %454 = vst [vmem:[#allocation2 + $0x20] sm:$0xff] %v2091_v16 }
  0x2e   : > { %455 = vst [vmem:[#allocation2 + $0x10] sm:$0xff] %v2091_v16  ;;  %456 = vst [vmem:[#allocation2 + $0x38] sm:$0xff] %v2091_v16 }
  0x2f   : > { %457 = vst [vmem:[#allocation2 + $0x60] sm:$0xff] %v2091_v16  ;;  %458 = vst [vmem:[#allocation2 + $0x70] sm:$0xff] %v2091_v16 }
  0x30   : > { %459 = vst [vmem:[#allocation2 + $0x78] sm:$0xff] %v2091_v16  ;;  %460 = vst [vmem:[#allocation2 + $0x28] sm:$0xff] %v2091_v16 }
  0x31 PF: > { %v1929_v17 = vld [vmem:[%s2196_s19 + $0x38] sm:$0xff]   ;;  %v1930_v18 = vld [vmem:[%s2196_s19 + $0x30] sm:$0xff]   ;;  %v1931_v19 = vld [vmem:[%s2196_s19 + $0x28] sm:$0xff]   ;;  %p1673_p11 = scmp.ne.s32.totalorder %s2081_s23, 1 }
  0x32   : > { %1823 = vmatprep.subr.bf16.mxu0 %v1929_v17  ;;  %1855 = vmatprep.subr.bf16.mxu1 %v1929_v17  ;;  %v1932_v20 = vld [vmem:[%s2196_s19 + $0x20] sm:$0xff]   ;;  %v1933_v23 = vld [vmem:[%s2196_s19 + $0x18] sm:$0xff]   ;;  %v1934_v24 = vld [vmem:[%s2196_s19 + $0x10] sm:$0xff]  }
  0x33   : > { %1824 = vmatpush3.bf16.msra.mxu0 %v1929_v17  ;;  %1863 = vmatpush3.bf16.msra.mxu1 %v1929_v17  ;;  %v1937_v21 = vld [vmem:[%s2198_s20] sm:$0xff]   ;;  %v1935_v25 = vld [vmem:[%s2196_s19 + $0x8] sm:$0xff]   ;;  %v1941_v29 = vld [vmem:[%s2198_s20 + $0x10] sm:$0xff]  }
  0x34   : > { %1825 = vmatprep.subr.bf16.mxu0 %v1930_v18  ;;  %1856 = vmatprep.subr.bf16.mxu1 %v1930_v18  ;;  %v1938_v22 = vld [vmem:[%s2198_s20 + $0x20] sm:$0xff]   ;;  %v1939_v27 = vld [vmem:[%s2198_s20 + $0x8] sm:$0xff]   ;;  %v1942_v30 = vld [vmem:[%s2198_s20 + $0x30] sm:$0xff]  }
  0x35   : > { %1839 = vmatprep.mubr.bf16.mxu0 %v1937_v21  ;;  %1847 = vmatprep.mubr.bf16.mxu1 %v1938_v22  ;;  %v1936_v26 = vld [vmem:[%s2196_s19] sm:$0xff]   ;;  %v1940_v28 = vld [vmem:[%s2198_s20 + $0x28] sm:$0xff]   ;;  %v1943_v31 = vld [vmem:[%s2198_s20 + $0x18] sm:$0xff]  }
  0x36   : > { %v1944_v32 = vld [vmem:[%s2198_s20 + $0x38] sm:$0xff]   ;;  %v471_v34 = vld [vmem:[#allocation2 + $0x10] sm:$0xff]  ;;  %v469_v38 = vld [vmem:[#allocation2 + $0x40] sm:$0xff] }
  0x37   : > { %1826 = vmatpush3.bf16.msra.mxu0 %v1930_v18  ;;  %1864 = vmatpush3.bf16.msra.mxu1 %v1930_v18  ;;  %v463_v33 = vld [vmem:[#allocation2 + $0x58] sm:$0xff]  ;;  %v461_v37 = vld [vmem:[#allocation2 + $0x30] sm:$0xff]  ;;  %v462_v49 = vld [vmem:[#allocation2] sm:$0xff] }
  0x38   : > { %1827 = vmatprep.subr.bf16.mxu0 %v1931_v19  ;;  %1857 = vmatprep.subr.bf16.mxu1 %v1931_v19  ;;  %v464_v43 = vld [vmem:[#allocation2 + $0x18] sm:$0xff]  ;;  %v470_v50 = vld [vmem:[#allocation2 + $0x20] sm:$0xff]  ;;  %v467_v55 = vld [vmem:[#allocation2 + $0x8] sm:$0xff] }
  0x39   : > { %v472_v44 = vld [vmem:[#allocation2 + $0x38] sm:$0xff]  ;;  %v465_v61 = vld [vmem:[#allocation2 + $0x50] sm:$0xff]  ;;  %v473_v62 = vld [vmem:[#allocation2 + $0x60] sm:$0xff] }
  0x3a   : > { %v475_v56 = vld [vmem:[#allocation2 + $0x78] sm:$0xff]  ;;  %v468_v3 = vld [vmem:[#allocation2 + $0x48] sm:$0xff]  ;;  %v474_v10 = vld [vmem:[#allocation2 + $0x70] sm:$0xff] }
  0x3b   : > { %1828 = vmatpush3.bf16.msra.mxu0 %v1931_v19  ;;  %1865 = vmatpush3.bf16.msra.mxu1 %v1931_v19  ;;  %v476_v4 = vld [vmem:[#allocation2 + $0x28] sm:$0xff] }
  0x3c   : > { %1829 = vmatprep.subr.bf16.mxu0 %v1932_v20  ;;  %1858 = vmatprep.subr.bf16.mxu1 %v1932_v20  ;;  %v466_v9 = vld [vmem:[#allocation2 + $0x68] sm:$0xff] }
  0x3f   : > { %1830 = vmatpush3.bf16.msra.mxu0 %v1932_v20  ;;  %1866 = vmatpush3.bf16.msra.mxu1 %v1932_v20 }
  0x40   : > { %1831 = vmatprep.subr.bf16.mxu0 %v1933_v23  ;;  %1859 = vmatprep.subr.bf16.mxu1 %v1933_v23 }
  0x43   : > { %1832 = vmatpush3.bf16.msra.mxu0 %v1933_v23  ;;  %1867 = vmatpush3.bf16.msra.mxu1 %v1933_v23 }
  0x44   : > { %1833 = vmatprep.subr.bf16.mxu0 %v1934_v24  ;;  %1860 = vmatprep.subr.bf16.mxu1 %v1934_v24 }
  0x47   : > { %1834 = vmatpush3.bf16.msra.mxu0 %v1934_v24  ;;  %1868 = vmatpush3.bf16.msra.mxu1 %v1934_v24 }
  0x48   : > { %1835 = vmatprep.subr.bf16.mxu0 %v1935_v25  ;;  %1861 = vmatprep.subr.bf16.mxu1 %v1935_v25 }
  0x4b   : > { %1836 = vmatpush3.bf16.msra.mxu0 %v1935_v25  ;;  %1869 = vmatpush3.bf16.msra.mxu1 %v1935_v25 }
  0x4c   : > { %1837 = vmatprep.subr.bf16.mxu0 %v1936_v26  ;;  %1862 = vmatprep.subr.bf16.mxu1 %v1936_v26 }
  0x4f   : > { %1838 = vmatpush3.bf16.msra.mxu0 %v1936_v26  ;;  %1870 = vmatpush3.bf16.msra.mxu1 %v1936_v26 }
  0x52   : > { %1840 = vmatmul.mubr.bf16.vlgmr.msra.gmra.mxu0 %v1939_v27  ;;  %1848 = vmatmul.mubr.bf16.vlgmr.msra.gmra.mxu1 %v1940_v28 }
  0x53   : > { %1843 = vmatprep.mubr.bf16.mxu0 %v1941_v29  ;;  %1851 = vmatprep.mubr.bf16.mxu1 %v1942_v30 }
  0x5a   : > { %1844 = vmatmul.mubr.bf16.gmra.mxu0 %v1943_v31  ;;  %1852 = vmatmul.mubr.bf16.gmra.mxu1 %v1944_v32 }
 0x112   : > { %v1841_v35 = vpop.f32.mrf.mxu0  ;;  %v1849_v36 = vpop.f32.mrf.mxu1 }
 0x113   : > { %v704_v39 = vadd.f32 %v1841_v35, %v463_v33  ;;  %v712_v40 = vadd.f32 %v1849_v36, %v471_v34 }
 0x114   : > { %v639_v41 = vpop.f32.mrf.mxu0  ;;  %v671_v42 = vpop.f32.mrf.mxu1 }
 0x115   : > { %720 = vst [vmem:[#allocation2 + $0x58] sm:$0xff] %v704_v39  ;;  %728 = vst [vmem:[#allocation2 + $0x10] sm:$0xff] %v712_v40  ;;  %v702_v45 = vadd.f32 %v639_v41, %v461_v37  ;;  %v710_v46 = vadd.f32 %v671_v42, %v469_v38 }
 0x116   : > { %v1842_v47 = vpop.f32.mrf.mxu0  ;;  %v1850_v48 = vpop.f32.mrf.mxu1 }
 0x117   : > { %718 = vst [vmem:[#allocation2 + $0x30] sm:$0xff] %v702_v45  ;;  %726 = vst [vmem:[#allocation2 + $0x40] sm:$0xff] %v710_v46  ;;  %v705_v51 = vadd.f32 %v1842_v47, %v464_v43  ;;  %v713_v52 = vadd.f32 %v1850_v48, %v472_v44 }
 0x118   : > { %v642_v53 = vpop.f32.mrf.mxu0  ;;  %v674_v54 = vpop.f32.mrf.mxu1 }
 0x119   : > { %721 = vst [vmem:[#allocation2 + $0x18] sm:$0xff] %v705_v51  ;;  %729 = vst [vmem:[#allocation2 + $0x38] sm:$0xff] %v713_v52  ;;  %v703_v57 = vadd.f32 %v642_v53, %v462_v49  ;;  %v711_v58 = vadd.f32 %v674_v54, %v470_v50 }
 0x11a   : > { %v1845_v59 = vpop.f32.mrf.mxu0  ;;  %v1853_v60 = vpop.f32.mrf.mxu1 }
 0x11b   : > { %719 = vst [vmem:[#allocation2] sm:$0xff] %v703_v57  ;;  %727 = vst [vmem:[#allocation2 + $0x20] sm:$0xff] %v711_v58  ;;  %v708_v63 = vadd.f32 %v1845_v59, %v467_v55  ;;  %v716_v0 = vadd.f32 %v1853_v60, %v475_v56 }
 0x11c   : > { %v655_v1 = vpop.f32.mrf.mxu0  ;;  %v687_v2 = vpop.f32.mrf.mxu1 }
 0x11d   : > { %724 = vst [vmem:[#allocation2 + $0x8] sm:$0xff] %v708_v63  ;;  %732 = vst [vmem:[#allocation2 + $0x78] sm:$0xff] %v716_v0  ;;  %v706_v5 = vadd.f32 %v655_v1, %v465_v61  ;;  %v714_v6 = vadd.f32 %v687_v2, %v473_v62 }
 0x11e   : > { %v1846_v7 = vpop.f32.mrf.mxu0  ;;  %v1854_v8 = vpop.f32.mrf.mxu1 }
 0x11f   : > { %722 = vst [vmem:[#allocation2 + $0x50] sm:$0xff] %v706_v5  ;;  %730 = vst [vmem:[#allocation2 + $0x60] sm:$0xff] %v714_v6  ;;  %v709_v11 = vadd.f32 %v1846_v7, %v468_v3  ;;  %v717_v12 = vadd.f32 %v1854_v8, %v476_v4  ;;  %737 = sbr.rel (%p1673_p11) target bundleno = 982 (0x3d6), region = 93 }
 0x120   : > { %v658_v13 = vpop.f32.mrf.mxu0  ;;  %v690_v14 = vpop.f32.mrf.mxu1 }
 0x121   : > { %725 = vst [vmem:[#allocation2 + $0x48] sm:$0xff] %v709_v11  ;;  %733 = vst [vmem:[#allocation2 + $0x28] sm:$0xff] %v717_v12  ;;  %v707_v15 = vadd.f32 %v658_v13, %v466_v9  ;;  %v715_v16 = vadd.f32 %v690_v14, %v474_v10 }
 0x123   : > { %723 = vst [vmem:[#allocation2 + $0x68] sm:$0xff] %v707_v15  ;;  %731 = vst [vmem:[#allocation2 + $0x70] sm:$0xff] %v715_v16 }
 0x124   : > { %v762_v17 = vld [vmem:[%s2676_s3 + $0x40] sm:$0xff]  ;;  %v2092_v19 = vmov 0   ;;  %v763_v20 = vld [vmem:[%s2676_s3 + $0x48] sm:$0xff]  ;;  %v757_v22 = vld [vmem:[%s2676_s3 + $0x18] sm:$0xff] }
 0x125   : > { %v754_v18 = vld [vmem:[%s2676_s3] sm:$0xff]  ;;  %1946 = vset.pattern.permute.xlu1 %v2092_v19  ;;  %1945 = vset.pattern.permute.xlu0 %v2092_v19  ;;  %v755_v21 = vld [vmem:[%s2676_s3 + $0x8] sm:$0xff]  ;;  %v756_v23 = vld [vmem:[%s2676_s3 + $0x10] sm:$0xff] }
 0x126   : > { %812 = vperm.xlu1 %1946, %v762_v17   ;;  %772 = vperm.xlu0 %1945, %v754_v18   ;;  %v1947_v24 = vld [vmem:[%s2677_s4 + $0x78] sm:$0xff]   ;;  %v1949_v26 = vld [vmem:[%s2677_s4 + $0x70] sm:$0xff]   ;;  %v1951_v30 = vld [vmem:[%s2677_s4 + $0x68] sm:$0xff]  }
 0x127   : > { %v1948_v25 = vld [vmem:[%s2677_s4 + $0x38] sm:$0xff]   ;;  %1759 = vmatprep.subr.bf16.mxu0 %v1947_v24  ;;  %1871 = vmatprep.subr.bf16.mxu1 %v1947_v24  ;;  %v1950_v28 = vld [vmem:[%s2677_s4 + $0x30] sm:$0xff]   ;;  %v1952_v31 = vld [vmem:[%s2677_s4 + $0x28] sm:$0xff]  }
 0x128   : > { %v765_v27 = vld [vmem:[%s2676_s3 + $0x58] sm:$0xff]  ;;  %1760 = vmatpush3.bf16.msra.mxu0 %v1948_v25  ;;  %1879 = vmatpush3.bf16.msra.mxu1 %v1948_v25  ;;  %v764_v29 = vld [vmem:[%s2676_s3 + $0x50] sm:$0xff]  ;;  %v759_v32 = vld [vmem:[%s2676_s3 + $0x28] sm:$0xff] }
 0x129   : > { %1761 = vmatprep.subr.bf16.mxu0 %v1949_v26  ;;  %1872 = vmatprep.subr.bf16.mxu1 %v1949_v26  ;;  %v758_v33 = vld [vmem:[%s2676_s3 + $0x20] sm:$0xff]  ;;  %v767_v35 = vld [vmem:[%s2676_s3 + $0x68] sm:$0xff]  ;;  %v1955_v38 = vld [vmem:[%s2677_s4 + $0x58] sm:$0xff]  }
 0x12a   : > { %817 = vperm.xlu1 %1946, %v763_v20   ;;  %777 = vperm.xlu0 %1945, %v755_v21   ;;  %v1953_v34 = vld [vmem:[%s2677_s4 + $0x60] sm:$0xff]   ;;  %v1956_v39 = vld [vmem:[%s2677_s4 + $0x18] sm:$0xff]   ;;  %v760_v41 = vld [vmem:[%s2676_s3 + $0x30] sm:$0xff] }
 0x12b   : > { %v1954_v36 = vld [vmem:[%s2677_s4 + $0x20] sm:$0xff]   ;;  %v761_v40 = vld [vmem:[%s2676_s3 + $0x38] sm:$0xff]  ;;  %v1957_v42 = vld [vmem:[%s2677_s4 + $0x50] sm:$0xff]  }
 0x12c   : > { %1762 = vmatpush3.bf16.msra.mxu0 %v1950_v28  ;;  %1880 = vmatpush3.bf16.msra.mxu1 %v1950_v28  ;;  %v766_v37 = vld [vmem:[%s2676_s3 + $0x60] sm:$0xff]  ;;  %v1958_v43 = vld [vmem:[%s2677_s4 + $0x10] sm:$0xff]   ;;  %v769_v48 = vld [vmem:[%s2676_s3 + $0x78] sm:$0xff] }
 0x12d   : > { %1763 = vmatprep.subr.bf16.mxu0 %v1951_v30  ;;  %1873 = vmatprep.subr.bf16.mxu1 %v1951_v30  ;;  %v946_v44 = vld [vmem:[%s2675_s2] sm:$0xf]  ;;  %v947_v45 = vld [vmem:[%s2675_s2 + $0x4] sm:$0xf]  ;;  %v948_v49 = vld [vmem:[%s2675_s2 + $0x8] sm:$0xf] }
 0x12e   : > { %787 = vperm.xlu1 %1946, %v757_v22   ;;  %782 = vperm.xlu0 %1945, %v756_v23   ;;  %962 = vst [vmem:[#allocation3 + $0x4] sm:$0xf] %v946_v44  ;;  %v954_v46 = vld [vmem:[%s2675_s2 + $0x20] sm:$0xf]  ;;  %v955_v47 = vld [vmem:[%s2675_s2 + $0x24] sm:$0xf] }
 0x12f   : > { %963 = vst [vmem:[#allocation3 + $0xc] sm:$0xf] %v947_v45  ;;  %970 = vst [vmem:[#allocation3 + $0x44] sm:$0xf] %v954_v46  ;;  %v768_v50 = vld [vmem:[%s2676_s3 + $0x70] sm:$0xff]  ;;  %v1959_v51 = vld [vmem:[%s2677_s4 + $0x48] sm:$0xff]  }
 0x130   : > { %1764 = vmatpush3.bf16.msra.mxu0 %v1952_v31  ;;  %1881 = vmatpush3.bf16.msra.mxu1 %v1952_v31  ;;  %971 = vst [vmem:[#allocation3 + $0x4c] sm:$0xf] %v955_v47  ;;  %v949_v52 = vld [vmem:[%s2675_s2 + $0xc] sm:$0xf]  ;;  %964 = vst [vmem:[#allocation3 + $0x14] sm:$0xf] %v948_v49 }
 0x131   : > { %1765 = vmatprep.subr.bf16.mxu0 %v1953_v34  ;;  %1874 = vmatprep.subr.bf16.mxu1 %v1953_v34  ;;  %v1960_v53 = vld [vmem:[%s2677_s4 + $0x8] sm:$0xff]   ;;  %965 = vst [vmem:[#allocation3 + $0x1c] sm:$0xf] %v949_v52  ;;  %v1961_v56 = vld [vmem:[%s2677_s4 + $0x40] sm:$0xff]   ;;  %v950_v57 = vld [vmem:[%s2675_s2 + $0x10] sm:$0xf] }
 0x132   : > { %827 = vperm.xlu1 %1946, %v765_v27   ;;  %822 = vperm.xlu0 %1945, %v764_v29   ;;  %v956_v54 = vld [vmem:[%s2675_s2 + $0x28] sm:$0xf]  ;;  %v957_v55 = vld [vmem:[%s2675_s2 + $0x2c] sm:$0xf]  ;;  %v951_v58 = vld [vmem:[%s2675_s2 + $0x14] sm:$0xf] }
 0x133   : > { %972 = vst [vmem:[#allocation3 + $0x54] sm:$0xf] %v956_v54  ;;  %973 = vst [vmem:[#allocation3 + $0x5c] sm:$0xf] %v957_v55  ;;  %v958_v59 = vld [vmem:[%s2675_s2 + $0x30] sm:$0xf] }
 0x134   : > { %1766 = vmatpush3.bf16.msra.mxu0 %v1954_v36  ;;  %1882 = vmatpush3.bf16.msra.mxu1 %v1954_v36  ;;  %966 = vst [vmem:[#allocation3 + $0x24] sm:$0xf] %v950_v57  ;;  %967 = vst [vmem:[#allocation3 + $0x2c] sm:$0xf] %v951_v58  ;;  %v959_v60 = vld [vmem:[%s2675_s2 + $0x34] sm:$0xf] }
 0x135   : > { %1767 = vmatprep.subr.bf16.mxu0 %v1955_v38  ;;  %1875 = vmatprep.subr.bf16.mxu1 %v1955_v38  ;;  %v952_v61 = vld [vmem:[%s2675_s2 + $0x18] sm:$0xf]  ;;  %974 = vst [vmem:[#allocation3 + $0x64] sm:$0xf] %v958_v59  ;;  %975 = vst [vmem:[#allocation3 + $0x6c] sm:$0xf] %v959_v60 }
 0x136   : > { %797 = vperm.xlu1 %1946, %v759_v32   ;;  %792 = vperm.xlu0 %1945, %v758_v33   ;;  %v953_v62 = vld [vmem:[%s2675_s2 + $0x1c] sm:$0xf]  ;;  %968 = vst [vmem:[#allocation3 + $0x34] sm:$0xf] %v952_v61  ;;  %v960_v63 = vld [vmem:[%s2675_s2 + $0x38] sm:$0xf] }
 0x137   : > { %v961_v0 = vld [vmem:[%s2675_s2 + $0x3c] sm:$0xf]  ;;  %969 = vst [vmem:[#allocation3 + $0x3c] sm:$0xf] %v953_v62  ;;  %976 = vst [vmem:[#allocation3 + $0x74] sm:$0xf] %v960_v63 }
 0x138   : > { %1768 = vmatpush3.bf16.msra.mxu0 %v1956_v39  ;;  %1883 = vmatpush3.bf16.msra.mxu1 %v1956_v39  ;;  %977 = vst [vmem:[#allocation3 + $0x7c] sm:$0xf] %v961_v0  ;;  %v1962_v1 = vld [vmem:[%s2677_s4] sm:$0xff]   ;;  %v738_v3 = vld [vmem:[#allocation2 + $0x30] sm:$0xff]  ;;  %v741_v16 = vld [vmem:[#allocation2 + $0x18] sm:$0xff] }
 0x139   : > { %1769 = vmatprep.subr.bf16.mxu0 %v1957_v42  ;;  %1876 = vmatprep.subr.bf16.mxu1 %v1957_v42  ;;  %v746_v2 = vld [vmem:[#allocation2 + $0x40] sm:$0xff]  ;;  %v740_v17 = vld [vmem:[#allocation2 + $0x58] sm:$0xff]  ;;  %v748_v25 = vld [vmem:[#allocation2 + $0x10] sm:$0xff] }
 0x13a   : > { %837 = vperm.xlu1 %1946, %v767_v35   ;;  %832 = vperm.xlu0 %1945, %v766_v37   ;;  %v747_v8 = vld [vmem:[#allocation2 + $0x20] sm:$0xff]  ;;  %v749_v24 = vld [vmem:[#allocation2 + $0x38] sm:$0xff]  ;;  %v743_v32 = vld [vmem:[#allocation2 + $0x68] sm:$0xff] }
 0x13b   : > { %v739_v9 = vld [vmem:[#allocation2] sm:$0xff]  ;;  %v742_v33 = vld [vmem:[#allocation2 + $0x50] sm:$0xff]  ;;  %v744_v54 = vld [vmem:[#allocation2 + $0x8] sm:$0xff] }
 0x13c   : > { %1770 = vmatpush3.bf16.msra.mxu0 %v1958_v43  ;;  %1884 = vmatpush3.bf16.msra.mxu1 %v1958_v43  ;;  %v1965_v39 = vld [vmem:[#allocation3 + $0x4] ss:$8 sps:$4 sm:$0xff]   ;;  %v751_v44 = vld [vmem:[#allocation2 + $0x70] sm:$0xff] }
 0x13d   : > { %1771 = vmatprep.subr.bf16.mxu0 %v1959_v51  ;;  %1877 = vmatprep.subr.bf16.mxu1 %v1959_v51  ;;  %v1968_v43 = vld [vmem:[#allocation3 + $0x44] ss:$8 sps:$4 sm:$0xff]   ;;  %v1971_v59 = vld [vmem:[#allocation3 + $0x54] ss:$8 sps:$4 sm:$0xff]  }
 0x13e   : > { %807 = vperm.xlu1 %1946, %v761_v40   ;;  %802 = vperm.xlu0 %1945, %v760_v41   ;;  %v750_v45 = vld [vmem:[#allocation2 + $0x60] sm:$0xff]  ;;  %v753_v0 = vld [vmem:[#allocation2 + $0x28] sm:$0xff] }
 0x13f   : > { %1241 = vmatprep.mubr.bf16.mxu0 %v1965_v39  ;;  %1273 = vmatprep.mubr.bf16.mxu1 %v1968_v43 }
 0x140   : > { %1772 = vmatpush3.bf16.msra.mxu0 %v1960_v53  ;;  %1885 = vmatpush3.bf16.msra.mxu1 %v1960_v53  ;;  %v745_v53 = vld [vmem:[#allocation2 + $0x48] sm:$0xff] }
 0x141   : > { %1773 = vmatprep.subr.bf16.mxu0 %v1961_v56  ;;  %1878 = vmatprep.subr.bf16.mxu1 %v1961_v56 }
 0x142   : > { %847 = vperm.xlu1 %1946, %v769_v48   ;;  %842 = vperm.xlu0 %1945, %v768_v50   ;;  %v1969_v50 = vld [vmem:[#allocation3 + $0x14] ss:$8 sps:$4 sm:$0xff]  }
 0x144   : > { %1774 = vmatpush3.bf16.msra.mxu0 %v1962_v1  ;;  %1886 = vmatpush3.bf16.msra.mxu1 %v1962_v1  ;;  %v752_v1 = vld [vmem:[#allocation2 + $0x78] sm:$0xff] }
 0x1a1   : > { %v813_v4 = vpop.permute.xlu1 %812  ;;  %v773_v5 = vpop.permute.xlu0 %772 }
 0x1a2   : > { %v858_v6 = vmul.f32 %v813_v4, %v746_v2  ;;  %v850_v7 = vmul.f32 %v773_v5, %v738_v3 }
 0x1a4   : > { %v1735_v10 = vpack.c.bf16 %v858_v6, %v858_v6  ;;  %v1727_v11 = vpack.c.bf16 %v850_v7, %v850_v7  ;;  %v1975_v6 = vld [vmem:[#allocation3 + $0x24] ss:$8 sps:$4 sm:$0xff]  }
 0x1a5   : > { %v818_v12 = vpop.permute.xlu1 %817  ;;  %v778_v13 = vpop.permute.xlu0 %777 }
 0x1a6   : > { %938 = vst [vmem:[#allocation3 + $0x40] sm:$0xf] %v1735_v10  ;;  %930 = vst [vmem:[#allocation3] sm:$0xf] %v1727_v11  ;;  %v859_v14 = vmul.f32 %v818_v12, %v747_v8  ;;  %v851_v15 = vmul.f32 %v778_v13, %v739_v9  ;;  %v1977_v11 = vld [vmem:[#allocation3 + $0x64] ss:$8 sps:$4 sm:$0xff]  }
 0x1a8   : > { %v1736_v18 = vpack.c.bf16 %v859_v14, %v859_v14  ;;  %v1728_v19 = vpack.c.bf16 %v851_v15, %v851_v15  ;;  %v1981_v14 = vld [vmem:[#allocation3 + $0x34] ss:$8 sps:$4 sm:$0xff]  }
 0x1a9   : > { %v788_v20 = vpop.permute.xlu1 %787  ;;  %v783_v21 = vpop.permute.xlu0 %782  ;;  %v1983_v15 = vld [vmem:[#allocation3 + $0x74] ss:$8 sps:$4 sm:$0xff]  }
 0x1aa   : > { %939 = vst [vmem:[#allocation3 + $0x48] sm:$0xf] %v1736_v18  ;;  %931 = vst [vmem:[#allocation3 + $0x8] sm:$0xf] %v1728_v19  ;;  %v853_v22 = vmul.f32 %v788_v20, %v741_v16  ;;  %v852_v23 = vmul.f32 %v783_v21, %v740_v17  ;;  %v1306_v18 = vlaneseq }
 0x1ac   : > { %v1730_v26 = vpack.c.bf16 %v853_v22, %v853_v22  ;;  %v1729_v27 = vpack.c.bf16 %v852_v23, %v852_v23  ;;  %v2362_v20 = vand.u32 127, %v1306_v18  ;;  %v2367_v23 = vld [vmem:[%s2678_s5] ss:$0 sm:$0xff] }
 0x1ad   : > { %v828_v28 = vpop.permute.xlu1 %827  ;;  %v823_v29 = vpop.permute.xlu0 %822 }
 0x1ae   : > { %933 = vst [vmem:[#allocation3 + $0x18] sm:$0xf] %v1730_v26  ;;  %932 = vst [vmem:[#allocation3 + $0x10] sm:$0xf] %v1729_v27  ;;  %v861_v30 = vmul.f32 %v828_v28, %v749_v24  ;;  %v860_v31 = vmul.f32 %v823_v29, %v748_v25  ;;  %vm1308_vm0 = vcmp.lt.s32.totalorder %v2362_v20, 8 }
 0x1b0   : > { %v1738_v34 = vpack.c.bf16 %v861_v30, %v861_v30  ;;  %v1737_v35 = vpack.c.bf16 %v860_v31, %v860_v31 }
 0x1b1   : > { %v798_v36 = vpop.permute.xlu1 %797  ;;  %v793_v37 = vpop.permute.xlu0 %792  ;;  %v1963_v38 = vld [vmem:[#allocation3] ss:$8 sps:$4 sm:$0xff]  }
 0x1b2   : > { %941 = vst [vmem:[#allocation3 + $0x58] sm:$0xf] %v1738_v34  ;;  %940 = vst [vmem:[#allocation3 + $0x50] sm:$0xf] %v1737_v35  ;;  %v855_v40 = vmul.f32 %v798_v36, %v743_v32  ;;  %v854_v41 = vmul.f32 %v793_v37, %v742_v33  ;;  %v1966_v42 = vld [vmem:[#allocation3 + $0x40] ss:$8 sps:$4 sm:$0xff]   ;;  %1242 = vmatmul.mubr.bf16.vlgmr.msra.gmra.mxu0 %v1963_v38 }
 0x1b3   : > { %1274 = vmatmul.mubr.bf16.vlgmr.msra.gmra.mxu1 %v1966_v42  ;;  %1249 = vmatprep.mubr.bf16.mxu0 %v1969_v50 }
 0x1b4   : > { %v1732_v46 = vpack.c.bf16 %v855_v40, %v855_v40  ;;  %v1731_v47 = vpack.c.bf16 %v854_v41, %v854_v41  ;;  %1281 = vmatprep.mubr.bf16.mxu1 %v1971_v59 }
 0x1b5   : > { %v838_v48 = vpop.permute.xlu1 %837  ;;  %v833_v49 = vpop.permute.xlu0 %832  ;;  %v1973_v62 = vld [vmem:[#allocation3 + $0x10] ss:$8 sps:$4 sm:$0xff]  }
 0x1b6   : > { %935 = vst [vmem:[#allocation3 + $0x28] sm:$0xf] %v1732_v46  ;;  %934 = vst [vmem:[#allocation3 + $0x20] sm:$0xf] %v1731_v47  ;;  %v863_v51 = vmul.f32 %v838_v48, %v751_v44  ;;  %v862_v52 = vmul.f32 %v833_v49, %v750_v45 }
 0x1b8   : > { %v1740_v55 = vpack.c.bf16 %v863_v51, %v863_v51  ;;  %v1739_v56 = vpack.c.bf16 %v862_v52, %v862_v52 }
 0x1b9   : > { %v808_v57 = vpop.permute.xlu1 %807  ;;  %v803_v58 = vpop.permute.xlu0 %802  ;;  %v1974_v63 = vld [vmem:[#allocation3 + $0x50] ss:$8 sps:$4 sm:$0xff]  }
 0x1ba   : > { %943 = vst [vmem:[#allocation3 + $0x68] sm:$0xf] %v1740_v55  ;;  %942 = vst [vmem:[#allocation3 + $0x60] sm:$0xf] %v1739_v56  ;;  %v857_v60 = vmul.f32 %v808_v57, %v745_v53  ;;  %v856_v61 = vmul.f32 %v803_v58, %v744_v54  ;;  %1250 = vmatmul.mubr.bf16.gmra.mxu0 %v1973_v62 }
 0x1bb   : > { %1282 = vmatmul.mubr.bf16.gmra.mxu1 %v1974_v63  ;;  %1257 = vmatprep.mubr.bf16.mxu0 %v1975_v6 }
 0x1bc   : > { %v1734_v2 = vpack.c.bf16 %v857_v60, %v857_v60  ;;  %v1733_v3 = vpack.c.bf16 %v856_v61, %v856_v61  ;;  %1289 = vmatprep.mubr.bf16.mxu1 %v1977_v11 }
 0x1bd   : > { %v848_v4 = vpop.permute.xlu1 %847  ;;  %v843_v5 = vpop.permute.xlu0 %842  ;;  %v1979_v12 = vld [vmem:[#allocation3 + $0x20] ss:$8 sps:$4 sm:$0xff]  }
 0x1be   : > { %937 = vst [vmem:[#allocation3 + $0x38] sm:$0xf] %v1734_v2  ;;  %936 = vst [vmem:[#allocation3 + $0x30] sm:$0xf] %v1733_v3  ;;  %v865_v7 = vmul.f32 %v848_v4, %v753_v0  ;;  %v864_v8 = vmul.f32 %v843_v5, %v752_v1 }
 0x1c0   : > { %v1742_v9 = vpack.c.bf16 %v865_v7, %v865_v7  ;;  %v1741_v10 = vpack.c.bf16 %v864_v8, %v864_v8 }
 0x1c1   : > { %v1980_v13 = vld [vmem:[#allocation3 + $0x60] ss:$8 sps:$4 sm:$0xff]  }
 0x1c2   : > { %945 = vst [vmem:[#allocation3 + $0x78] sm:$0xf] %v1742_v9  ;;  %944 = vst [vmem:[#allocation3 + $0x70] sm:$0xf] %v1741_v10  ;;  %1258 = vmatmul.mubr.bf16.gmra.mxu0 %v1979_v12 }
 0x1c3   : > { %1290 = vmatmul.mubr.bf16.gmra.mxu1 %v1980_v13  ;;  %1265 = vmatprep.mubr.bf16.mxu0 %v1981_v14 }
 0x1c4   : > { %1297 = vmatprep.mubr.bf16.mxu1 %v1983_v15 }
 0x1c5   : > { %v1985_v16 = vld [vmem:[#allocation3 + $0x30] ss:$8 sps:$4 sm:$0xff]  }
 0x1c9   : > { %v1986_v17 = vld [vmem:[#allocation3 + $0x70] ss:$8 sps:$4 sm:$0xff]  }
 0x1ca   : > { %1266 = vmatmul.mubr.bf16.gmra.mxu0 %v1985_v16 }
 0x1cb   : > { %1298 = vmatmul.mubr.bf16.gmra.mxu1 %v1986_v17 }
 0x272   : > { %v1775_v19 = vpop.f32.mrf.mxu0 }
 0x273   : > { %v1799_v21 = vpop.f32.mrf.mxu1 }
 0x274   : > { %v1776_v22 = vpop.f32.mrf.mxu0 }
 0x275   : > { %v1777_v24 = vadd.f32 %v1776_v22, %v1775_v19  ;;  %v1800_v25 = vpop.f32.mrf.mxu1 }
 0x276   : > { %v1801_v26 = vadd.f32 %v1800_v25, %v1799_v21  ;;  %v1778_v27 = vpop.f32.mrf.mxu0 }
 0x277   : > { %v1802_v28 = vpop.f32.mrf.mxu1  ;;  %v1244_v29 = vadd.f32 %v1777_v24, %v2367_v23 }
 0x278   : > { %v1779_v30 = vpop.f32.mrf.mxu0  ;;  %v1276_v31 = vadd.f32 %v1801_v26, %v2367_v23 }
 0x279   : > { %v1780_v32 = vadd.f32 %v1779_v30, %v1778_v27  ;;  %v1803_v33 = vpop.f32.mrf.mxu1  ;;  %v2374_v34 = vsel %vm1308_vm0, %v1244_v29, -1e+30 }
 0x27a   : > { %v1804_v35 = vadd.f32 %v1803_v33, %v1802_v28  ;;  %v2378_v36 = vsel %vm1308_vm0, %v1276_v31, -1e+30  ;;  %v1781_v37 = vpop.f32.mrf.mxu0  ;;  %1325 = vmax.xlane.f32.xlu0 %v2374_v34 }
 0x27b   : > { %v1805_v38 = vpop.f32.mrf.mxu1  ;;  %1341 = vmax.xlane.f32.xlu1 %v2378_v36  ;;  %v1247_v39 = vadd.f32 %v1780_v32, %v2367_v23 }
 0x27c   : > { %v1782_v40 = vpop.f32.mrf.mxu0  ;;  %v1279_v41 = vadd.f32 %v1804_v35, %v2367_v23 }
 0x27d   : > { %v1783_v42 = vadd.f32 %v1782_v40, %v1781_v37  ;;  %v1806_v43 = vpop.f32.mrf.mxu1  ;;  %v2386_v44 = vsel %vm1308_vm0, %v1247_v39, -1e+30 }
 0x27e   : > { %v1807_v45 = vadd.f32 %v1806_v43, %v1805_v38  ;;  %v1784_v46 = vpop.f32.mrf.mxu0  ;;  %v2390_v47 = vsel %vm1308_vm0, %v1279_v41, -1e+30 }
 0x27f   : > { %v1808_v48 = vpop.f32.mrf.mxu1  ;;  %1327 = vmax.xlane.f32.xlu1 %v2386_v44  ;;  %1343 = vmax.xlane.f32.xlu0 %v2390_v47  ;;  %v1252_v49 = vadd.f32 %v1783_v42, %v2367_v23 }
 0x280   : > { %v1785_v50 = vpop.f32.mrf.mxu0  ;;  %v1284_v51 = vadd.f32 %v1807_v45, %v2367_v23 }
 0x281   : > { %v1786_v52 = vadd.f32 %v1785_v50, %v1784_v46  ;;  %v1809_v53 = vpop.f32.mrf.mxu1  ;;  %v2398_v54 = vsel %vm1308_vm0, %v1252_v49, -1e+30 }
 0x282   : > { %v1810_v55 = vadd.f32 %v1809_v53, %v1808_v48  ;;  %v1787_v56 = vpop.f32.mrf.mxu0  ;;  %v2402_v57 = vsel %vm1308_vm0, %v1284_v51, -1e+30 }
 0x283   : > { %v1811_v58 = vpop.f32.mrf.mxu1  ;;  %1345 = vmax.xlane.f32.xlu1 %v2402_v57  ;;  %1329 = vmax.xlane.f32.xlu0 %v2398_v54  ;;  %v1255_v59 = vadd.f32 %v1786_v52, %v2367_v23 }
 0x284   : > { %v1788_v60 = vpop.f32.mrf.mxu0  ;;  %v1287_v2 = vadd.f32 %v1810_v55, %v2367_v23 }
 0x285   : > { %v1789_v61 = vadd.f32 %v1788_v60, %v1787_v56  ;;  %v1812_v62 = vpop.f32.mrf.mxu1  ;;  %v2409_v63 = vsel %vm1308_vm0, %v1255_v59, -1e+30 }
 0x286   : > { %v1813_v0 = vadd.f32 %v1812_v62, %v1811_v58  ;;  %v1790_v1 = vpop.f32.mrf.mxu0  ;;  %v2422_v12 = vsel %vm1308_vm0, %v1287_v2, -1e+30 }
 0x287   : > { %v1814_v3 = vpop.f32.mrf.mxu1  ;;  %1331 = vmax.xlane.f32.xlu0 %v2409_v63  ;;  %v1260_v4 = vadd.f32 %v1789_v61, %v2367_v23 }
 0x288   : > { %v1791_v5 = vpop.f32.mrf.mxu0  ;;  %v1292_v9 = vadd.f32 %v1813_v0, %v2367_v23 }
 0x289   : > { %v1792_v6 = vadd.f32 %v1791_v5, %v1790_v1  ;;  %v1815_v7 = vpop.f32.mrf.mxu1  ;;  %v2416_v8 = vsel %vm1308_vm0, %v1260_v4, -1e+30 }
 0x28a   : > { %v1816_v10 = vadd.f32 %v1815_v7, %v1814_v3  ;;  %v1793_v11 = vpop.f32.mrf.mxu0  ;;  %1333 = vmax.xlane.f32.xlu1 %v2416_v8  ;;  %v2428_v18 = vsel %vm1308_vm0, %v1292_v9, -1e+30 }
 0x28b   : > { %v1817_v13 = vpop.f32.mrf.mxu1  ;;  %1347 = vmax.xlane.f32.xlu0 %v2422_v12  ;;  %v1263_v14 = vadd.f32 %v1792_v6, %v2367_v23 }
 0x28c   : > { %v1794_v15 = vpop.f32.mrf.mxu0  ;;  %v1295_v24 = vadd.f32 %v1816_v10, %v2367_v23 }
 0x28d   : > { %v1795_v16 = vadd.f32 %v1794_v15, %v1793_v11  ;;  %v1818_v17 = vpop.f32.mrf.mxu1  ;;  %v2432_v19 = vsel %vm1308_vm0, %v1263_v14, -1e+30 }
 0x28e   : > { %v1819_v21 = vadd.f32 %v1818_v17, %v1817_v13  ;;  %v1796_v22 = vpop.f32.mrf.mxu0  ;;  %1349 = vmax.xlane.f32.xlu1 %v2428_v18  ;;  %v2446_v33 = vsel %vm1308_vm0, %v1295_v24, -1e+30 }
 0x28f   : > { %v1820_v25 = vpop.f32.mrf.mxu1  ;;  %1335 = vmax.xlane.f32.xlu0 %v2432_v19  ;;  %v1268_v26 = vadd.f32 %v1795_v16, %v2367_v23 }
 0x290   : > { %v1797_v27 = vpop.f32.mrf.mxu0  ;;  %v1300_v31 = vadd.f32 %v1819_v21, %v2367_v23 }
 0x291   : > { %v1798_v28 = vadd.f32 %v1797_v27, %v1796_v22  ;;  %v1821_v29 = vpop.f32.mrf.mxu1  ;;  %v2440_v30 = vsel %vm1308_vm0, %v1268_v26, -1e+30 }
 0x292   : > { %v1822_v32 = vadd.f32 %v1821_v29, %v1820_v25  ;;  %1337 = vmax.xlane.f32.xlu1 %v2440_v30  ;;  %v2452_v37 = vsel %vm1308_vm0, %v1300_v31, -1e+30 }
 0x293   : > { %1351 = vmax.xlane.f32.xlu0 %v2446_v33  ;;  %v1271_v35 = vadd.f32 %v1798_v28, %v2367_v23 }
 0x294   : > { %v1303_v39 = vadd.f32 %v1822_v32, %v2367_v23 }
 0x295   : > { %v2456_v38 = vsel %vm1308_vm0, %v1271_v35, -1e+30 }
 0x296   : > { %1353 = vmax.xlane.f32.xlu1 %v2452_v37  ;;  %v2463_v40 = vsel %vm1308_vm0, %v1303_v39, -1e+30 }
 0x297   : > { %1339 = vmax.xlane.f32.xlu0 %v2456_v38 }
 0x29b   : > { %1355 = vmax.xlane.f32.xlu0 %v2463_v40 }
 0x303   : > { %v1326_v41 = vpop.xlane.xlu0 %1325 }
 0x304   : > { %v1342_v42 = vpop.xlane.xlu1 %1341  ;;  %v2467_v43 = vsub.f32 %v2374_v34, %v1326_v41 }
 0x305   : > { %v2470_v45 = vsub.f32 %v2378_v36, %v1342_v42 }
 0x306   : > { %v1373_v46 = vmul.f32 1.442695, %v2467_v43 }
 0x307   : > { %v1389_v23 = vmul.f32 1.442695, %v2470_v45 }
 0x308   : > { %1987 = vpow2.f32 %v1373_v46  ;;  %v1328_v48 = vpop.xlane.xlu1 %1327  ;;  %v1344_v49 = vpop.xlane.xlu0 %1343 }
 0x309   : > { %v2475_v50 = vsub.f32 %v2386_v44, %v1328_v48  ;;  %v2478_v51 = vsub.f32 %v2390_v47, %v1344_v49  ;;  %1989 = vpow2.f32 %v1389_v23 }
 0x30b   : > { %v1375_v34 = vmul.f32 1.442695, %v2475_v50  ;;  %v1391_v52 = vmul.f32 1.442695, %v2478_v51 }
 0x30c   : > { %v1346_v36 = vpop.xlane.xlu1 %1345  ;;  %v1330_v53 = vpop.xlane.xlu0 %1329 }
 0x30d   : > { %1991 = vpow2.f32 %v1375_v34  ;;  %v2483_v55 = vsub.f32 %v2402_v57, %v1346_v36  ;;  %v2486_v56 = vsub.f32 %v2398_v54, %v1330_v53 }
 0x30e   : > { %1993 = vpow2.f32 %v1391_v52 }
 0x30f   : > { %v1377_v44 = vmul.f32 1.442695, %v2486_v56  ;;  %v1393_v47 = vmul.f32 1.442695, %v2483_v55 }
 0x310   : > { %v1332_v58 = vpop.xlane.xlu0 %1331 }
 0x311   : > { %v2491_v59 = vsub.f32 %v2409_v63, %v1332_v58  ;;  %1995 = vpow2.f32 %v1377_v44 }
 0x312   : > { %1997 = vpow2.f32 %v1393_v47 }
 0x313   : > { %v1379_v60 = vmul.f32 1.442695, %v2491_v59  ;;  %v1334_v61 = vpop.xlane.xlu1 %1333 }
 0x314   : > { %v2495_v57 = vsub.f32 %v2416_v8, %v1334_v61  ;;  %v1348_v62 = vpop.xlane.xlu0 %1347 }
 0x315   : > { %v1988_v54 = vpop.eup %1987  ;;  %1999 = vpow2.f32 %v1379_v60  ;;  %v2498_v0 = vsub.f32 %v2422_v12, %v1348_v62 }
 0x316   : > { %v1381_v1 = vmul.f32 1.442695, %v2495_v57  ;;  %v1405_v63 = vsel %vm1308_vm0, %v1988_v54, 0.0  ;;  %v1990_v2 = vpop.eup %1989 }
 0x317   : > { %v1395_v3 = vmul.f32 1.442695, %v2498_v0  ;;  %v1350_v4 = vpop.xlane.xlu1 %1349  ;;  %1421 = vadd.xlane.f32.xlu1 %v1405_v63  ;;  %v1413_v10 = vsel %vm1308_vm0, %v1990_v2, 0.0 }
 0x318   : > { %2001 = vpow2.f32 %v1381_v1  ;;  %v2505_v5 = vsub.f32 %v2428_v18, %v1350_v4  ;;  %v1336_v6 = vpop.xlane.xlu0 %1335 }
 0x319   : > { %2003 = vpow2.f32 %v1395_v3  ;;  %v2508_v7 = vsub.f32 %v2432_v19, %v1336_v6 }
 0x31a   : > { %v1992_v8 = vpop.eup %1991  ;;  %v1397_v9 = vmul.f32 1.442695, %v2505_v5 }
 0x31b   : > { %v1383_v11 = vmul.f32 1.442695, %v2508_v7  ;;  %v1338_v12 = vpop.xlane.xlu1 %1337  ;;  %v1406_v13 = vsel %vm1308_vm0, %v1992_v8, 0.0  ;;  %1437 = vadd.xlane.f32.xlu1 %v1413_v10  ;;  %v1994_v14 = vpop.eup %1993 }
 0x31c   : > { %2005 = vpow2.f32 %v1397_v9  ;;  %v2517_v15 = vsub.f32 %v2440_v30, %v1338_v12  ;;  %1423 = vadd.xlane.f32.xlu0 %v1406_v13  ;;  %v1352_v16 = vpop.xlane.xlu0 %1351  ;;  %v1414_v24 = vsel %vm1308_vm0, %v1994_v14, 0.0 }
 0x31d   : > { %2007 = vpow2.f32 %v1383_v11  ;;  %v2520_v17 = vsub.f32 %v2446_v33, %v1352_v16 }
 0x31e   : > { %v1385_v18 = vmul.f32 1.442695, %v2517_v15  ;;  %v1996_v19 = vpop.eup %1995 }
 0x31f   : > { %v1399_v21 = vmul.f32 1.442695, %v2520_v17  ;;  %v1354_v22 = vpop.xlane.xlu1 %1353  ;;  %v1407_v26 = vsel %vm1308_vm0, %v1996_v19, 0.0  ;;  %v1998_v28 = vpop.eup %1997 }
 0x320   : > { %2009 = vpow2.f32 %v1385_v18  ;;  %v2527_v25 = vsub.f32 %v2452_v37, %v1354_v22  ;;  %1439 = vadd.xlane.f32.xlu0 %v1414_v24  ;;  %v1340_v27 = vpop.xlane.xlu0 %1339  ;;  %1425 = vadd.xlane.f32.xlu1 %v1407_v26  ;;  %v1415_v35 = vsel %vm1308_vm0, %v1998_v28, 0.0 }
 0x321   : > { %2011 = vpow2.f32 %v1399_v21  ;;  %v2532_v29 = vsub.f32 %v2456_v38, %v1340_v27 }
 0x322   : > { %v2000_v30 = vpop.eup %1999  ;;  %v1401_v31 = vmul.f32 1.442695, %v2527_v25 }
 0x323   : > { %v1387_v32 = vmul.f32 1.442695, %v2532_v29  ;;  %v1408_v33 = vsel %vm1308_vm0, %v2000_v30, 0.0 }
 0x324   : > { %2013 = vpow2.f32 %v1401_v31  ;;  %1427 = vadd.xlane.f32.xlu0 %v1408_v33  ;;  %v1356_v37 = vpop.xlane.xlu0 %1355  ;;  %1441 = vadd.xlane.f32.xlu1 %v1415_v35 }
 0x325   : > { %v2002_v39 = vpop.eup %2001  ;;  %2015 = vpow2.f32 %v1387_v32  ;;  %v2541_v38 = vsub.f32 %v2463_v40, %v1356_v37 }
 0x326   : > { %v2004_v41 = vpop.eup %2003  ;;  %v1409_v42 = vsel %vm1308_vm0, %v2002_v39, 0.0 }
 0x327   : > { %v1403_v46 = vmul.f32 1.442695, %v2541_v38  ;;  %v1416_v23 = vsel %vm1308_vm0, %v2004_v41, 0.0 }
 0x328   : > { %1443 = vadd.xlane.f32.xlu0 %v1416_v23  ;;  %1429 = vadd.xlane.f32.xlu1 %v1409_v42 }
 0x329   : > { %v2006_v48 = vpop.eup %2005  ;;  %2017 = vpow2.f32 %v1403_v46 }
 0x32a   : > { %v2008_v49 = vpop.eup %2007  ;;  %v1417_v34 = vsel %vm1308_vm0, %v2006_v48, 0.0 }
 0x32b   : > { %v1410_v40 = vsel %vm1308_vm0, %v2008_v49, 0.0 }
 0x32c   : > { %1431 = vadd.xlane.f32.xlu0 %v1410_v40  ;;  %1445 = vadd.xlane.f32.xlu1 %v1417_v34 }
 0x32d   : > { %v2010_v52 = vpop.eup %2009 }
 0x32e   : > { %v2012_v36 = vpop.eup %2011  ;;  %v1411_v53 = vsel %vm1308_vm0, %v2010_v52, 0.0 }
 0x32f   : > { %v1418_v44 = vsel %vm1308_vm0, %v2012_v36, 0.0 }
 0x330   : > { %1447 = vadd.xlane.f32.xlu0 %v1418_v44  ;;  %1433 = vadd.xlane.f32.xlu1 %v1411_v53 }
 0x331   : > { %v2014_v47 = vpop.eup %2013 }
 0x332   : > { %v2016_v58 = vpop.eup %2015  ;;  %v1419_v60 = vsel %vm1308_vm0, %v2014_v47, 0.0 }
 0x333   : > { %v1412_v61 = vsel %vm1308_vm0, %v2016_v58, 0.0 }
 0x334   : > { %1435 = vadd.xlane.f32.xlu0 %v1412_v61  ;;  %1449 = vadd.xlane.f32.xlu1 %v1419_v60 }
 0x336   : > { %v2018_v62 = vpop.eup %2017 }
 0x337   : > { %v1420_v54 = vsel %vm1308_vm0, %v2018_v62, 0.0 }
 0x338   : > { %1451 = vadd.xlane.f32.xlu0 %v1420_v54 }
 0x3a0   : > { %v1422_v1 = vpop.xlane.xlu1 %1421 }
 0x3a1   : > { %2019 = vlog2.f32 %v1422_v1 }
 0x3a4   : > { %v1438_v63 = vpop.xlane.xlu1 %1437 }
 0x3a5   : > { %2021 = vlog2.f32 %v1438_v63  ;;  %v1424_v2 = vpop.xlane.xlu0 %1423 }
 0x3a6   : > { %2023 = vlog2.f32 %v1424_v2 }
 0x3a9   : > { %v1440_v3 = vpop.xlane.xlu0 %1439  ;;  %v1426_v4 = vpop.xlane.xlu1 %1425 }
 0x3aa   : > { %2025 = vlog2.f32 %v1440_v3 }
 0x3ab   : > { %2027 = vlog2.f32 %v1426_v4 }
 0x3ad   : > { %v1428_v6 = vpop.xlane.xlu0 %1427  ;;  %v1442_v9 = vpop.xlane.xlu1 %1441 }
 0x3ae   : > { %v2020_v8 = vpop.eup %2019  ;;  %2029 = vlog2.f32 %v1428_v6 }
 0x3af   : > { %v1454_v10 = vmul.f32 0.6931472, %v2020_v8  ;;  %2031 = vlog2.f32 %v1442_v9 }
 0x3b1   : > { %v1485_v11 = vsub.f32 %v2467_v43, %v1454_v10  ;;  %v1444_v12 = vpop.xlane.xlu0 %1443  ;;  %v1430_v14 = vpop.xlane.xlu1 %1429 }
 0x3b2   : > { %v2022_v13 = vpop.eup %2021  ;;  %2033 = vlog2.f32 %v1444_v12 }
 0x3b3   : > { %v2024_v16 = vpop.eup %2023  ;;  %v1501_v18 = vsel %vm1308_vm0, %v1485_v11, 0.0  ;;  %v1470_v19 = vmul.f32 0.6931472, %v2022_v13  ;;  %2035 = vlog2.f32 %v1430_v14 }
 0x3b4   : > { %1517 = vst [vmem:[%s2679_s6] sm:$0xff] %v1501_v18  ;;  %v1456_v21 = vmul.f32 0.6931472, %v2024_v16 }
 0x3b5   : > { %v1493_v22 = vsub.f32 %v2470_v45, %v1470_v19  ;;  %v1432_v24 = vpop.xlane.xlu0 %1431  ;;  %v1446_v26 = vpop.xlane.xlu1 %1445 }
 0x3b6   : > { %v1486_v43 = vsub.f32 %v2475_v50, %v1456_v21  ;;  %2037 = vlog2.f32 %v1432_v24 }
 0x3b7   : > { %v2026_v27 = vpop.eup %2025  ;;  %v1509_v28 = vsel %vm1308_vm0, %v1493_v22, 0.0  ;;  %2039 = vlog2.f32 %v1446_v26 }
 0x3b8   : > { %v2028_v30 = vpop.eup %2027  ;;  %1525 = vst [vmem:[%s2679_s6 + $0x40] sm:$0xff] %v1509_v28  ;;  %v1502_v31 = vsel %vm1308_vm0, %v1486_v43, 0.0  ;;  %v1472_v32 = vmul.f32 0.6931472, %v2026_v27 }
 0x3b9   : > { %1518 = vst [vmem:[%s2679_s6 + $0x8] sm:$0xff] %v1502_v31  ;;  %v1458_v45 = vmul.f32 0.6931472, %v2028_v30  ;;  %v1448_v50 = vpop.xlane.xlu0 %1447  ;;  %v1434_v35 = vpop.xlane.xlu1 %1433 }
 0x3ba   : > { %v1494_v33 = vsub.f32 %v2478_v51, %v1472_v32  ;;  %2041 = vlog2.f32 %v1448_v50 }
 0x3bb   : > { %v2030_v37 = vpop.eup %2029  ;;  %v1487_v39 = vsub.f32 %v2486_v56, %v1458_v45  ;;  %2043 = vlog2.f32 %v1434_v35 }
 0x3bc   : > { %v2032_v41 = vpop.eup %2031  ;;  %v1510_v42 = vsel %vm1308_vm0, %v1494_v33, 0.0  ;;  %v1460_v46 = vmul.f32 0.6931472, %v2030_v37 }
 0x3bd   : > { %v1503_v23 = vsel %vm1308_vm0, %v1487_v39, 0.0  ;;  %1526 = vst [vmem:[%s2679_s6 + $0x48] sm:$0xff] %v1510_v42  ;;  %v1474_v48 = vmul.f32 0.6931472, %v2032_v41  ;;  %v1436_v51 = vpop.xlane.xlu0 %1435  ;;  %v1450_v49 = vpop.xlane.xlu1 %1449 }
 0x3be   : > { %1519 = vst [vmem:[%s2679_s6 + $0x10] sm:$0xff] %v1503_v23  ;;  %v1488_v56 = vsub.f32 %v2491_v59, %v1460_v46  ;;  %2045 = vlog2.f32 %v1436_v51 }
 0x3bf   : > { %v2034_v34 = vpop.eup %2033  ;;  %v1495_v40 = vsub.f32 %v2483_v55, %v1474_v48  ;;  %2047 = vlog2.f32 %v1450_v49 }
 0x3c0   : > { %v2036_v52 = vpop.eup %2035  ;;  %v1504_v36 = vsel %vm1308_vm0, %v1488_v56, 0.0  ;;  %v1476_v53 = vmul.f32 0.6931472, %v2034_v34 }
 0x3c1   : > { %v1511_v44 = vsel %vm1308_vm0, %v1495_v40, 0.0  ;;  %1520 = vst [vmem:[%s2679_s6 + $0x18] sm:$0xff] %v1504_v36  ;;  %v1462_v47 = vmul.f32 0.6931472, %v2036_v52  ;;  %v1452_v59 = vpop.xlane.xlu0 %1451 }
 0x3c2   : > { %1527 = vst [vmem:[%s2679_s6 + $0x50] sm:$0xff] %v1511_v44  ;;  %v1496_v55 = vsub.f32 %v2498_v0, %v1476_v53  ;;  %2049 = vlog2.f32 %v1452_v59 }
 0x3c3   : > { %v2038_v58 = vpop.eup %2037  ;;  %v1489_v60 = vsub.f32 %v2495_v57, %v1462_v47 }
 0x3c4   : > { %v2040_v61 = vpop.eup %2039  ;;  %v1512_v62 = vsel %vm1308_vm0, %v1496_v55, 0.0  ;;  %v1464_v54 = vmul.f32 0.6931472, %v2038_v58 }
 0x3c5   : > { %v1505_v1 = vsel %vm1308_vm0, %v1489_v60, 0.0  ;;  %1528 = vst [vmem:[%s2679_s6 + $0x58] sm:$0xff] %v1512_v62  ;;  %v1478_v63 = vmul.f32 0.6931472, %v2040_v61 }
 0x3c6   : > { %1521 = vst [vmem:[%s2679_s6 + $0x20] sm:$0xff] %v1505_v1  ;;  %v1490_v0 = vsub.f32 %v2508_v7, %v1464_v54 }
 0x3c7   : > { %v2042_v57 = vpop.eup %2041  ;;  %v1497_v2 = vsub.f32 %v2505_v5, %v1478_v63 }
 0x3c8   : > { %v2044_v3 = vpop.eup %2043  ;;  %v1506_v4 = vsel %vm1308_vm0, %v1490_v0, 0.0  ;;  %v1480_v6 = vmul.f32 0.6931472, %v2042_v57 }
 0x3c9   : > { %v1513_v8 = vsel %vm1308_vm0, %v1497_v2, 0.0  ;;  %1522 = vst [vmem:[%s2679_s6 + $0x28] sm:$0xff] %v1506_v4  ;;  %v1466_v9 = vmul.f32 0.6931472, %v2044_v3 }
 0x3ca   : > { %1529 = vst [vmem:[%s2679_s6 + $0x60] sm:$0xff] %v1513_v8  ;;  %v1498_v7 = vsub.f32 %v2520_v17, %v1480_v6 }
 0x3cb   : > { %v2046_v5 = vpop.eup %2045  ;;  %v1491_v10 = vsub.f32 %v2517_v15, %v1466_v9 }
 0x3cc   : > { %v2048_v11 = vpop.eup %2047  ;;  %v1514_v12 = vsel %vm1308_vm0, %v1498_v7, 0.0  ;;  %v1468_v13 = vmul.f32 0.6931472, %v2046_v5 }
 0x3cd   : > { %v1507_v14 = vsel %vm1308_vm0, %v1491_v10, 0.0  ;;  %1530 = vst [vmem:[%s2679_s6 + $0x68] sm:$0xff] %v1514_v12  ;;  %v1482_v16 = vmul.f32 0.6931472, %v2048_v11 }
 0x3ce   : > { %1523 = vst [vmem:[%s2679_s6 + $0x30] sm:$0xff] %v1507_v14  ;;  %v1492_v17 = vsub.f32 %v2532_v29, %v1468_v13 }
 0x3cf   : > { %v2050_v15 = vpop.eup %2049  ;;  %v1499_v18 = vsub.f32 %v2527_v25, %v1482_v16 }
 0x3d0   : > { %v1508_v19 = vsel %vm1308_vm0, %v1492_v17, 0.0  ;;  %v1484_v21 = vmul.f32 0.6931472, %v2050_v15 }
 0x3d1   : > { %v1515_v22 = vsel %vm1308_vm0, %v1499_v18, 0.0  ;;  %1524 = vst [vmem:[%s2679_s6 + $0x38] sm:$0xff] %v1508_v19 }
 0x3d2   : > { %1531 = vst [vmem:[%s2679_s6 + $0x70] sm:$0xff] %v1515_v22  ;;  %v1500_v29 = vsub.f32 %v2541_v38, %v1484_v21 }
 0x3d4   : > { %v1516_v25 = vsel %vm1308_vm0, %v1500_v29, 0.0 }
 0x3d5   : > { %1532 = vst [vmem:[%s2679_s6 + $0x78] sm:$0xff] %v1516_v25 }
 0x3d6 PF: > { %s16_s25 = sadd.s32 1, %s2089_s25   ;;  %s2680_s21 = smov %s2077_s22 }
 0x3d7   : > { %p13_p12 = scmp.ge.s32.totalorder %s16_s25, 4   ;;  %s2681_s22 = smov %s2163_s29 }
 0x3d8   : > { %s2682_s23 = smov %s2085_s24  ;;  %s2683_s24 = smov %s2685_s26 }
 0x3d9   :  { %15 = sbr.rel (!%p13_p12) target bundleno = 3 (0x3), region = 137 }

</bundles_post_ra>
